<compile_context>
chip_gen: v5e
topology: v5e:2x2
jax: 0.10.0
libtpu: 0.0.40
codegen_flags: <defaults>
</compile_context>

<pallas_src>
import numpy as np

import jax
import jax.numpy as jnp
from jax.experimental import pallas as pl
from jax.experimental.pallas import tpu as pltpu


# ---------------------------------------------------------------------------
# Architecture hyper-parameters (AttnSleep-style MRCNN + AFR)
# ---------------------------------------------------------------------------
L_IN = 256
B1 = dict(k1=16, s1=4, p1=8, pk1=4, ps1=2, pp1=2, k2=5, p2=2, pk2=2, ps2=2, pp2=0)
B2 = dict(k1=64, s1=16, p1=32, pk1=3, ps1=2, pp1=1, k2=3, p2=1, pk2=2, ps2=2, pp2=0)


def _conv_out(l, k, s, p):
    return (l + 2 * p - k) // s + 1


L1A = _conv_out(L_IN, B1["k1"], B1["s1"], B1["p1"])      # 65
T1A = _conv_out(L1A, B1["pk1"], B1["ps1"], B1["pp1"])    # 33
T2A = _conv_out(T1A, B1["pk2"], B1["ps2"], B1["pp2"])    # 16
L1B = _conv_out(L_IN, B2["k1"], B2["s1"], B2["p1"])      # 17
T1B = _conv_out(L1B, B2["pk1"], B2["ps1"], B2["pp1"])    # 9
T2B = _conv_out(T1B, B2["pk2"], B2["ps2"], B2["pp2"])    # 4
N_LEN = T2A + T2B                                        # 20


# ---------------------------------------------------------------------------
# In-kernel helpers (operate on VMEM values; all shapes static)
# ---------------------------------------------------------------------------
def _gelu(v):
    c = 0.7978845608028654  # sqrt(2/pi)
    return 0.5 * v * (1.0 + jnp.tanh(c * (v + 0.044715 * v * v * v)))


def _shift_cols(h, d):
    """s[:, t] = h[:, t + d] with zero fill outside range (conv zero padding).

    Pure lane shift on the VPU/XLU — replaces the old (T,T) shift matmuls.
    """
    if d == 0:
        return h
    c, t = h.shape
    z = jnp.zeros((c, abs(d)), h.dtype)
    if d > 0:
        return jnp.concatenate([h[:, d:], z], axis=1)
    return jnp.concatenate([z, h[:, : t + d]], axis=1)


def _pool_max(y, sel, msk, k, t_out):
    """Stride-s window max pool.

    One lane-packed selection matmul emits all k candidate columns (the MXU
    output lanes are padded to 128 anyway, so the extra columns are free);
    out-of-range taps get an additive -1e30 mask; max over the k lane slices.
    """
    cand = jnp.dot(y, sel, preferred_element_type=jnp.float32) + msk
    h = cand[:, 0:t_out]
    for j in range(1, k):
        h = jnp.maximum(h, cand[:, j * t_out:(j + 1) * t_out])
    return h


def _mrcnn_branch(patches, w1, s1, p1s, p1m, w2f, s2, p2s, p2m,
                  pk1, t1, k2, pad2, pk2, t2):
    """conv1+BN+GELU -> maxpool -> conv2+BN+GELU -> maxpool, all in VMEM."""
    # conv1 (strided stem, BN scale folded into w1), shift + GELU.
    y1 = _gelu(jnp.dot(w1, patches, preferred_element_type=jnp.float32) + s1)

    # fused max-pool 1 (single packed selection matmul).
    h = _pool_max(y1, p1s, p1m, pk1, t1)                 # (C1, t1)

    # conv2 (stride 1, zero pad): K2 lane-shifted copies stacked along channels
    # -> ONE K-deep matmul against the pre-concatenated weight.
    stacked = jnp.concatenate([_shift_cols(h, j - pad2) for j in range(k2)],
                              axis=0)                    # (k2*C1, t1)
    y2 = _gelu(jnp.dot(w2f, stacked, preferred_element_type=jnp.float32) + s2)

    # fused max-pool 2.
    return _pool_max(y2, p2s, p2m, pk2, t2)              # (C2, t2)


def _model_blue_kernel(p1_ref, p2_ref,
                       w1a_ref, s1a_ref, p1sa_ref, p1ma_ref,
                       w2fa_ref, s2a_ref, p2sa_ref, p2ma_ref,
                       w1b_ref, s1b_ref, p1sb_ref, p1mb_ref,
                       w2fb_ref, s2b_ref, p2sb_ref, p2mb_ref,
                       aw1_ref, as1_ref, aw2_ref, as2_ref,
                       sew1_ref, sew2_ref, awd_ref, asd_ref,
                       fcw_ref, fcb_ref,
                       out_ref):
    # ----- MRCNN: both multi-resolution branches, fully fused -----
    z1 = _mrcnn_branch(p1_ref[0], w1a_ref[...], s1a_ref[...],
                       p1sa_ref[...], p1ma_ref[...],
                       w2fa_ref[...], s2a_ref[...], p2sa_ref[...], p2ma_ref[...],
                       B1["pk1"], T1A, B1["k2"], B1["p2"], B1["pk2"], T2A)  # (16,16)
    z2 = _mrcnn_branch(p2_ref[0], w1b_ref[...], s1b_ref[...],
                       p1sb_ref[...], p1mb_ref[...],
                       w2fb_ref[...], s2b_ref[...], p2sb_ref[...], p2mb_ref[...],
                       B2["pk1"], T1B, B2["k2"], B2["p2"], B2["pk2"], T2B)  # (16,4)

    # MRCNN length-concat: cheap in-VMEM lane concat -> one matmul per AFR op.
    z = jnp.concatenate([z1, z2], axis=1)                                   # (16,20)

    # ----- AFR (SE basic block) -----
    a1 = jnp.maximum(jnp.dot(aw1_ref[...], z, preferred_element_type=jnp.float32)
                     + as1_ref[...], 0.0)                                   # (8,20)
    a2 = jnp.dot(aw2_ref[...], a1, preferred_element_type=jnp.float32) + as2_ref[...]

    # squeeze & excite gate (tiny matvecs)
    pooled = jnp.sum(a2, axis=1, keepdims=True) * (1.0 / a2.shape[1])       # (8,1)
    hid = jnp.maximum(jnp.dot(sew1_ref[...], pooled,
                              preferred_element_type=jnp.float32), 0.0)     # (2,1)
    gate = jax.nn.sigmoid(jnp.dot(sew2_ref[...], hid,
                                  preferred_element_type=jnp.float32))      # (8,1)

    # downsample residual + add + ReLU
    res = jnp.dot(awd_ref[...], z, preferred_element_type=jnp.float32) + asd_ref[...]
    o = jnp.maximum(a2 * gate + res, 0.0)                                   # (8,20)

    # ----- final Linear: torch.flatten(c,t) folded into per-class slabs.
    # 5 VPU multiplies + XLU lane reduces + one sublane reduce (no MXU ops).
    cols = [jnp.sum(o * fcw_ref[k], axis=1, keepdims=True) for k in range(5)]
    q = jnp.concatenate(cols, axis=1)                                       # (8,5)
    out_ref[0] = jnp.sum(q, axis=0, keepdims=True) + fcb_ref[...]           # (1,5)


# ---------------------------------------------------------------------------
# Host-side constant builders (pure numpy, computed once at setup)
# ---------------------------------------------------------------------------
def _pool_consts(l_in, k, stride, pad):
    """Lane-packed max-pool selection matrix (l_in, k*T) + additive -inf mask."""
    t_out = (l_in + 2 * pad - k) // stride + 1
    sel = np.zeros((l_in, k * t_out), np.float32)
    msk = np.zeros((1, k * t_out), np.float32)
    for j in range(k):
        for t in range(t_out):
            i = t * stride + j - pad
            col = j * t_out + t
            if 0 <= i < l_in:
                sel[i, col] = 1.0
            else:
                msk[0, col] = -1e30
    return jnp.asarray(sel), jnp.asarray(msk), t_out


def _patch_idx(l_in, k, stride, pad):
    t_out = (l_in + 2 * pad - k) // stride + 1
    idx = np.arange(t_out, dtype=np.int32)[None, :] * stride \
        + np.arange(k, dtype=np.int32)[:, None]          # padded coordinates
    return jnp.asarray(idx, jnp.int32), t_out


# ---------------------------------------------------------------------------
# Deterministic synthetic parameters (same shapes / semantics as the module)
# ---------------------------------------------------------------------------
def _normal(key, shape, std=0.1):
    return std * jax.random.normal(key, shape, dtype=jnp.float32)


def build_params():
    keys = jax.random.split(jax.random.PRNGKey(42), 32)
    ki = iter(range(32))
    p = {}

    def nk():
        return keys[next(ki)]

    # ---- MRCNN branch 1 (fine temporal resolution) ----
    p["b1_conv1_w"] = _normal(nk(), (8, 1, 16))
    p["b1_bn1_g"] = 1.0 + _normal(nk(), (8,), 0.05)
    p["b1_bn1_b"] = _normal(nk(), (8,), 0.05)
    p["b1_conv2_w"] = _normal(nk(), (16, 8, 5))
    p["b1_bn2_g"] = 1.0 + _normal(nk(), (16,), 0.05)
    p["b1_bn2_b"] = _normal(nk(), (16,), 0.05)

    # ---- MRCNN branch 2 (coarse temporal resolution) ----
    p["b2_conv1_w"] = _normal(nk(), (8, 1, 64))
    p["b2_bn1_g"] = 1.0 + _normal(nk(), (8,), 0.05)
    p["b2_bn1_b"] = _normal(nk(), (8,), 0.05)
    p["b2_conv2_w"] = _normal(nk(), (16, 8, 3))
    p["b2_bn2_g"] = 1.0 + _normal(nk(), (16,), 0.05)
    p["b2_bn2_b"] = _normal(nk(), (16,), 0.05)

    # ---- AFR: one SE basic block, 16 -> 8 channels, SE reduction 4 ----
    p["afr_conv1_w"] = _normal(nk(), (8, 16, 1))
    p["afr_conv1_b"] = _normal(nk(), (8,), 0.05)
    p["afr_bn1_g"] = 1.0 + _normal(nk(), (8,), 0.05)
    p["afr_bn1_b"] = _normal(nk(), (8,), 0.05)
    p["afr_conv2_w"] = _normal(nk(), (8, 8, 1))
    p["afr_conv2_b"] = _normal(nk(), (8,), 0.05)
    p["afr_bn2_g"] = 1.0 + _normal(nk(), (8,), 0.05)
    p["afr_bn2_b"] = _normal(nk(), (8,), 0.05)
    p["afr_se_w1"] = _normal(nk(), (8, 2))
    p["afr_se_w2"] = _normal(nk(), (2, 8))
    p["afr_down_w"] = _normal(nk(), (8, 16, 1))
    p["afr_down_bn_g"] = 1.0 + _normal(nk(), (8,), 0.05)
    p["afr_down_bn_b"] = _normal(nk(), (8,), 0.05)

    # ---- Final linear: (8 channels * 20 length) -> 5 classes ----
    p["fc_w"] = _normal(nk(), (5, 8 * N_LEN))
    p["fc_b"] = _normal(nk(), (5,), 0.05)
    return p


def build_operands(p):
    """Fold BatchNorm into weights/shifts and build all kernel constants."""
    ops = {}

    def fold(gamma, beta, bias=None, eps=1e-5):
        scale = gamma / jnp.sqrt(1.0 + eps)     # eval mode, running mean 0 / var 1
        shift = beta if bias is None else beta + scale * bias
        return scale, shift

    # ---------- MRCNN branch 1 ----------
    ops["idx1a"], _ = _patch_idx(L_IN, B1["k1"], B1["s1"], B1["p1"])
    sc, sh = fold(p["b1_bn1_g"], p["b1_bn1_b"])
    ops["w1a"] = p["b1_conv1_w"][:, 0, :] * sc[:, None]                 # (8, 16)
    ops["s1a"] = sh.reshape(-1, 1)
    ops["p1sa"], ops["p1ma"], _ = _pool_consts(L1A, B1["pk1"], B1["ps1"], B1["pp1"])
    sc, sh = fold(p["b1_bn2_g"], p["b1_bn2_b"])
    w2 = p["b1_conv2_w"] * sc[:, None, None]                            # (16, 8, 5)
    ops["w2fa"] = jnp.transpose(w2, (0, 2, 1)).reshape(16, -1)          # (16, 40)
    ops["s2a"] = sh.reshape(-1, 1)
    ops["p2sa"], ops["p2ma"], _ = _pool_consts(T1A, B1["pk2"], B1["ps2"], B1["pp2"])

    # ---------- MRCNN branch 2 ----------
    ops["idx1b"], _ = _patch_idx(L_IN, B2["k1"], B2["s1"], B2["p1"])
    sc, sh = fold(p["b2_bn1_g"], p["b2_bn1_b"])
    ops["w1b"] = p["b2_conv1_w"][:, 0, :] * sc[:, None]                 # (8, 64)
    ops["s1b"] = sh.reshape(-1, 1)
    ops["p1sb"], ops["p1mb"], _ = _pool_consts(L1B, B2["pk1"], B2["ps1"], B2["pp1"])
    sc, sh = fold(p["b2_bn2_g"], p["b2_bn2_b"])
    w2 = p["b2_conv2_w"] * sc[:, None, None]                            # (16, 8, 3)
    ops["w2fb"] = jnp.transpose(w2, (0, 2, 1)).reshape(16, -1)          # (16, 24)
    ops["s2b"] = sh.reshape(-1, 1)
    ops["p2sb"], ops["p2mb"], _ = _pool_consts(T1B, B2["pk2"], B2["ps2"], B2["pp2"])

    # ---------- AFR (SE basic block) ----------
    sc, sh = fold(p["afr_bn1_g"], p["afr_bn1_b"], p["afr_conv1_b"])
    ops["aw1"] = p["afr_conv1_w"][:, :, 0] * sc[:, None]                # (8, 16)
    ops["as1"] = sh.reshape(-1, 1)
    sc, sh = fold(p["afr_bn2_g"], p["afr_bn2_b"], p["afr_conv2_b"])
    ops["aw2"] = p["afr_conv2_w"][:, :, 0] * sc[:, None]                # (8, 8)
    ops["as2"] = sh.reshape(-1, 1)
    ops["sew1"] = p["afr_se_w1"].T                                      # (2, 8)
    ops["sew2"] = p["afr_se_w2"].T                                      # (8, 2)
    sc, sh = fold(p["afr_down_bn_g"], p["afr_down_bn_b"])
    ops["awd"] = p["afr_down_w"][:, :, 0] * sc[:, None]                 # (8, 16)
    ops["asd"] = sh.reshape(-1, 1)

    # ---------- final Linear: flatten(c, t) folded into per-class slabs ----
    ops["fcw"] = p["fc_w"].reshape(5, 8, N_LEN)                         # (5, 8, 20)
    ops["fcb"] = p["fc_b"].reshape(1, -1)                               # (1, 5)
    return ops


_CONST_ORDER = ("w1a", "s1a", "p1sa", "p1ma", "w2fa", "s2a", "p2sa", "p2ma",
                "w1b", "s1b", "p1sb", "p1mb", "w2fb", "s2b", "p2sb", "p2mb",
                "aw1", "as1", "aw2", "as2", "sew1", "sew2", "awd", "asd",
                "fcw", "fcb")


# ---------------------------------------------------------------------------
# Forward: 2 tiny XLA gathers for the strided stem patches, then ONE Pallas call
# ---------------------------------------------------------------------------
@jax.jit
def model_blue_forward(ops, x):
    b = x.shape[0]
    x2 = x[:, 0, :].astype(jnp.float32)                                 # (B, 256)

    # im2col patch gather for the two strided stem convs (single gather each).
    xp = jnp.pad(x2, ((0, 0), (B1["p1"], B1["p1"])))
    patches1 = xp[:, ops["idx1a"]]                                      # (B, 16, 65)
    xp = jnp.pad(x2, ((0, 0), (B2["p1"], B2["p1"])))
    patches2 = xp[:, ops["idx1b"]]                                      # (B, 64, 17)

    consts = tuple(ops[k] for k in _CONST_ORDER)

    def _row_spec(a):
        rest = a.ndim - 1
        return pl.BlockSpec((1,) + tuple(a.shape[1:]),
                            lambda i, _r=rest: (i,) + (0,) * _r)

    def _full_spec(a):
        zeros = (0,) * a.ndim
        return pl.BlockSpec(tuple(a.shape), lambda i, _z=zeros: _z)

    in_specs = [_row_spec(patches1), _row_spec(patches2)]
    in_specs += [_full_spec(a) for a in consts]

    bytes_accessed = 4 * (patches1.size + patches2.size
                          + sum(int(a.size) for a in consts) + b * 5)
    cost = pl.CostEstimate(flops=1_200_000, transcendentals=6_000,
                           bytes_accessed=int(bytes_accessed))

    out = pl.pallas_call(
        _model_blue_kernel,
        out_shape=jax.ShapeDtypeStruct((b, 1, 5), jnp.float32),
        grid=(b,),
        in_specs=in_specs,
        out_specs=pl.BlockSpec((1, 1, 5), lambda i: (i, 0, 0)),
        compiler_params=pltpu.CompilerParams(
            dimension_semantics=("parallel",)),   # v7x: batch rows shard across TCs
        cost_estimate=cost,
    )(patches1, patches2, *consts)
    return out.reshape(b, 5)


# ---------------------------------------------------------------------------
if __name__ == "__main__":
    params = build_params()
    operands = build_operands(params)
    x = jax.random.normal(jax.random.PRNGKey(0), (2, 1, 256), dtype=jnp.float32)

    logits = model_blue_forward(operands, x)
    logits = jax.block_until_ready(logits)

    assert logits.shape == (2, 5), logits.shape
    assert bool(jnp.all(jnp.isfinite(logits)))
    print("KERNEL_OK")
</pallas_src>

<mosaic_0001>
module attributes {stable_mosaic.version = 11 : i64} {
  func.func @_model_blue_kernel(%arg0: i32, %arg1: memref<1x16x65xf32, #tpu.memory_space<vmem>>, %arg2: memref<1x64x17xf32, #tpu.memory_space<vmem>>, %arg3: memref<8x16xf32, #tpu.memory_space<vmem>>, %arg4: memref<8x1xf32, #tpu.memory_space<vmem>>, %arg5: memref<65x132xf32, #tpu.memory_space<vmem>>, %arg6: memref<1x132xf32, #tpu.memory_space<vmem>>, %arg7: memref<16x40xf32, #tpu.memory_space<vmem>>, %arg8: memref<16x1xf32, #tpu.memory_space<vmem>>, %arg9: memref<33x32xf32, #tpu.memory_space<vmem>>, %arg10: memref<1x32xf32, #tpu.memory_space<vmem>>, %arg11: memref<8x64xf32, #tpu.memory_space<vmem>>, %arg12: memref<8x1xf32, #tpu.memory_space<vmem>>, %arg13: memref<17x27xf32, #tpu.memory_space<vmem>>, %arg14: memref<1x27xf32, #tpu.memory_space<vmem>>, %arg15: memref<16x24xf32, #tpu.memory_space<vmem>>, %arg16: memref<16x1xf32, #tpu.memory_space<vmem>>, %arg17: memref<9x8xf32, #tpu.memory_space<vmem>>, %arg18: memref<1x8xf32, #tpu.memory_space<vmem>>, %arg19: memref<8x16xf32, #tpu.memory_space<vmem>>, %arg20: memref<8x1xf32, #tpu.memory_space<vmem>>, %arg21: memref<8x8xf32, #tpu.memory_space<vmem>>, %arg22: memref<8x1xf32, #tpu.memory_space<vmem>>, %arg23: memref<2x8xf32, #tpu.memory_space<vmem>>, %arg24: memref<8x2xf32, #tpu.memory_space<vmem>>, %arg25: memref<8x16xf32, #tpu.memory_space<vmem>>, %arg26: memref<8x1xf32, #tpu.memory_space<vmem>>, %arg27: memref<5x8x20xf32, #tpu.memory_space<vmem>>, %arg28: memref<1x5xf32, #tpu.memory_space<vmem>>, %arg29: memref<1x1x5xf32, #tpu.memory_space<vmem>>) attributes {dimension_semantics = [#tpu.dimension_semantics<parallel>], iteration_bounds = array<i64: 2>, scalar_prefetch = 0 : i64, scratch_operands = 0 : i64, tpu.core_type = #tpu.core_type<tc>, window_params = [{transform_indices = @transform_0, window_bounds = array<i64: 1, 16, 65>}, {transform_indices = @transform_1, window_bounds = array<i64: 1, 64, 17>}, {pipeline_mode = #tpu.pipeline_mode<synchronous>, transform_indices = @transform_2, window_bounds = array<i64: 8, 16>}, {pipeline_mode = #tpu.pipeline_mode<synchronous>, transform_indices = @transform_3, window_bounds = array<i64: 8, 1>}, {pipeline_mode = #tpu.pipeline_mode<synchronous>, transform_indices = @transform_4, window_bounds = array<i64: 65, 132>}, {pipeline_mode = #tpu.pipeline_mode<synchronous>, transform_indices = @transform_5, window_bounds = array<i64: 1, 132>}, {pipeline_mode = #tpu.pipeline_mode<synchronous>, transform_indices = @transform_6, window_bounds = array<i64: 16, 40>}, {pipeline_mode = #tpu.pipeline_mode<synchronous>, transform_indices = @transform_7, window_bounds = array<i64: 16, 1>}, {pipeline_mode = #tpu.pipeline_mode<synchronous>, transform_indices = @transform_8, window_bounds = array<i64: 33, 32>}, {pipeline_mode = #tpu.pipeline_mode<synchronous>, transform_indices = @transform_9, window_bounds = array<i64: 1, 32>}, {pipeline_mode = #tpu.pipeline_mode<synchronous>, transform_indices = @transform_10, window_bounds = array<i64: 8, 64>}, {pipeline_mode = #tpu.pipeline_mode<synchronous>, transform_indices = @transform_11, window_bounds = array<i64: 8, 1>}, {pipeline_mode = #tpu.pipeline_mode<synchronous>, transform_indices = @transform_12, window_bounds = array<i64: 17, 27>}, {pipeline_mode = #tpu.pipeline_mode<synchronous>, transform_indices = @transform_13, window_bounds = array<i64: 1, 27>}, {pipeline_mode = #tpu.pipeline_mode<synchronous>, transform_indices = @transform_14, window_bounds = array<i64: 16, 24>}, {pipeline_mode = #tpu.pipeline_mode<synchronous>, transform_indices = @transform_15, window_bounds = array<i64: 16, 1>}, {pipeline_mode = #tpu.pipeline_mode<synchronous>, transform_indices = @transform_16, window_bounds = array<i64: 9, 8>}, {pipeline_mode = #tpu.pipeline_mode<synchronous>, transform_indices = @transform_17, window_bounds = array<i64: 1, 8>}, {pipeline_mode = #tpu.pipeline_mode<synchronous>, transform_indices = @transform_18, window_bounds = array<i64: 8, 16>}, {pipeline_mode = #tpu.pipeline_mode<synchronous>, transform_indices = @transform_19, window_bounds = array<i64: 8, 1>}, {pipeline_mode = #tpu.pipeline_mode<synchronous>, transform_indices = @transform_20, window_bounds = array<i64: 8, 8>}, {pipeline_mode = #tpu.pipeline_mode<synchronous>, transform_indices = @transform_21, window_bounds = array<i64: 8, 1>}, {pipeline_mode = #tpu.pipeline_mode<synchronous>, transform_indices = @transform_22, window_bounds = array<i64: 2, 8>}, {pipeline_mode = #tpu.pipeline_mode<synchronous>, transform_indices = @transform_23, window_bounds = array<i64: 8, 2>}, {pipeline_mode = #tpu.pipeline_mode<synchronous>, transform_indices = @transform_24, window_bounds = array<i64: 8, 16>}, {pipeline_mode = #tpu.pipeline_mode<synchronous>, transform_indices = @transform_25, window_bounds = array<i64: 8, 1>}, {pipeline_mode = #tpu.pipeline_mode<synchronous>, transform_indices = @transform_26, window_bounds = array<i64: 5, 8, 20>}, {pipeline_mode = #tpu.pipeline_mode<synchronous>, transform_indices = @transform_27, window_bounds = array<i64: 1, 5>}, {transform_indices = @transform_28, window_bounds = array<i64: 1, 1, 5>}]} {
    %c0 = arith.constant 0 : index
    %c0_0 = arith.constant 0 : index
    %c0_1 = arith.constant 0 : index
    %0 = vector.load %arg1[%c0, %c0_0, %c0_1] : memref<1x16x65xf32, #tpu.memory_space<vmem>>, vector<1x16x65xf32>
    %1 = vector.shape_cast %0 : vector<1x16x65xf32> to vector<16x65xf32>
    %c0_2 = arith.constant 0 : index
    %c0_3 = arith.constant 0 : index
    %2 = vector.load %arg3[%c0_2, %c0_3] : memref<8x16xf32, #tpu.memory_space<vmem>>, vector<8x16xf32>
    %c0_4 = arith.constant 0 : index
    %c0_5 = arith.constant 0 : index
    %3 = vector.load %arg4[%c0_4, %c0_5] : memref<8x1xf32, #tpu.memory_space<vmem>>, vector<8x1xf32>
    %c0_6 = arith.constant 0 : index
    %c0_7 = arith.constant 0 : index
    %4 = vector.load %arg5[%c0_6, %c0_7] : memref<65x132xf32, #tpu.memory_space<vmem>>, vector<65x132xf32>
    %c0_8 = arith.constant 0 : index
    %c0_9 = arith.constant 0 : index
    %5 = vector.load %arg6[%c0_8, %c0_9] : memref<1x132xf32, #tpu.memory_space<vmem>>, vector<1x132xf32>
    %c0_10 = arith.constant 0 : index
    %c0_11 = arith.constant 0 : index
    %6 = vector.load %arg7[%c0_10, %c0_11] : memref<16x40xf32, #tpu.memory_space<vmem>>, vector<16x40xf32>
    %c0_12 = arith.constant 0 : index
    %c0_13 = arith.constant 0 : index
    %7 = vector.load %arg8[%c0_12, %c0_13] : memref<16x1xf32, #tpu.memory_space<vmem>>, vector<16x1xf32>
    %c0_14 = arith.constant 0 : index
    %c0_15 = arith.constant 0 : index
    %8 = vector.load %arg9[%c0_14, %c0_15] : memref<33x32xf32, #tpu.memory_space<vmem>>, vector<33x32xf32>
    %c0_16 = arith.constant 0 : index
    %c0_17 = arith.constant 0 : index
    %9 = vector.load %arg10[%c0_16, %c0_17] : memref<1x32xf32, #tpu.memory_space<vmem>>, vector<1x32xf32>
    %cst = arith.constant dense<0.000000e+00> : vector<8x65xf32>
    %10 = tpu.matmul %2, %1, %cst {dimension_numbers = #tpu.dot_dimension_numbers<[1], [0], [0], [1], [0, 0, 1, 1], [], []>} : vector<8x16xf32>, vector<16x65xf32>, vector<8x65xf32> -> vector<8x65xf32>
    %11 = vector.broadcast %3 : vector<8x1xf32> to vector<8x65xf32>
    %12 = arith.addf %10, %11 : vector<8x65xf32>
    %cst_18 = arith.constant 5.000000e-01 : f32
    %13 = vector.broadcast %cst_18 : f32 to vector<8x65xf32>
    %14 = arith.mulf %13, %12 : vector<8x65xf32>
    %cst_19 = arith.constant 4.471500e-02 : f32
    %15 = vector.broadcast %cst_19 : f32 to vector<8x65xf32>
    %16 = arith.mulf %15, %12 : vector<8x65xf32>
    %17 = arith.mulf %16, %12 : vector<8x65xf32>
    %18 = arith.mulf %17, %12 : vector<8x65xf32>
    %19 = arith.addf %12, %18 : vector<8x65xf32>
    %cst_20 = arith.constant 0.797884583 : f32
    %20 = vector.broadcast %cst_20 : f32 to vector<8x65xf32>
    %21 = arith.mulf %20, %19 : vector<8x65xf32>
    %22 = math.tanh %21 : vector<8x65xf32>
    %cst_21 = arith.constant 1.000000e+00 : f32
    %23 = vector.broadcast %cst_21 : f32 to vector<8x65xf32>
    %24 = arith.addf %23, %22 : vector<8x65xf32>
    %25 = arith.mulf %14, %24 : vector<8x65xf32>
    %cst_22 = arith.constant dense<0.000000e+00> : vector<8x132xf32>
    %26 = tpu.matmul %25, %4, %cst_22 {dimension_numbers = #tpu.dot_dimension_numbers<[1], [0], [0], [1], [0, 0, 1, 1], [], []>} : vector<8x65xf32>, vector<65x132xf32>, vector<8x132xf32> -> vector<8x132xf32>
    %27 = vector.broadcast %5 : vector<1x132xf32> to vector<8x132xf32>
    %28 = arith.addf %26, %27 : vector<8x132xf32>
    %29 = vector.extract_strided_slice %28 {offsets = [0, 0], sizes = [8, 33], strides = [1, 1]} : vector<8x132xf32> to vector<8x33xf32>
    %30 = vector.extract_strided_slice %28 {offsets = [0, 33], sizes = [8, 33], strides = [1, 1]} : vector<8x132xf32> to vector<8x33xf32>
    %31 = arith.maximumf %29, %30 : vector<8x33xf32>
    %32 = vector.extract_strided_slice %28 {offsets = [0, 66], sizes = [8, 33], strides = [1, 1]} : vector<8x132xf32> to vector<8x33xf32>
    %33 = arith.maximumf %31, %32 : vector<8x33xf32>
    %34 = vector.extract_strided_slice %28 {offsets = [0, 99], sizes = [8, 33], strides = [1, 1]} : vector<8x132xf32> to vector<8x33xf32>
    %35 = arith.maximumf %33, %34 : vector<8x33xf32>
    %cst_23 = arith.constant 0.000000e+00 : f32
    %36 = vector.broadcast %cst_23 : f32 to vector<8x2xf32>
    %37 = vector.extract_strided_slice %35 {offsets = [0, 0], sizes = [8, 31], strides = [1, 1]} : vector<8x33xf32> to vector<8x31xf32>
    %38 = tpu.concatenate %36, %37 in 1 : vector<8x2xf32>, vector<8x31xf32> -> vector<8x33xf32>
    %cst_24 = arith.constant 0.000000e+00 : f32
    %39 = vector.broadcast %cst_24 : f32 to vector<8x1xf32>
    %40 = vector.extract_strided_slice %35 {offsets = [0, 0], sizes = [8, 32], strides = [1, 1]} : vector<8x33xf32> to vector<8x32xf32>
    %41 = tpu.concatenate %39, %40 in 1 : vector<8x1xf32>, vector<8x32xf32> -> vector<8x33xf32>
    %cst_25 = arith.constant 0.000000e+00 : f32
    %42 = vector.broadcast %cst_25 : f32 to vector<8x1xf32>
    %43 = vector.extract_strided_slice %35 {offsets = [0, 1], sizes = [8, 32], strides = [1, 1]} : vector<8x33xf32> to vector<8x32xf32>
    %44 = tpu.concatenate %43, %42 in 1 : vector<8x32xf32>, vector<8x1xf32> -> vector<8x33xf32>
    %cst_26 = arith.constant 0.000000e+00 : f32
    %45 = vector.broadcast %cst_26 : f32 to vector<8x2xf32>
    %46 = vector.extract_strided_slice %35 {offsets = [0, 2], sizes = [8, 31], strides = [1, 1]} : vector<8x33xf32> to vector<8x31xf32>
    %47 = tpu.concatenate %46, %45 in 1 : vector<8x31xf32>, vector<8x2xf32> -> vector<8x33xf32>
    %48 = tpu.concatenate %38, %41, %35, %44, %47 in 0 : vector<8x33xf32>, vector<8x33xf32>, vector<8x33xf32>, vector<8x33xf32>, vector<8x33xf32> -> vector<40x33xf32>
    %cst_27 = arith.constant dense<0.000000e+00> : vector<16x33xf32>
    %49 = tpu.matmul %6, %48, %cst_27 {dimension_numbers = #tpu.dot_dimension_numbers<[1], [0], [0], [1], [0, 0, 1, 1], [], []>} : vector<16x40xf32>, vector<40x33xf32>, vector<16x33xf32> -> vector<16x33xf32>
    %50 = vector.broadcast %7 : vector<16x1xf32> to vector<16x33xf32>
    %51 = arith.addf %49, %50 : vector<16x33xf32>
    %cst_28 = arith.constant 5.000000e-01 : f32
    %52 = vector.broadcast %cst_28 : f32 to vector<16x33xf32>
    %53 = arith.mulf %52, %51 : vector<16x33xf32>
    %cst_29 = arith.constant 4.471500e-02 : f32
    %54 = vector.broadcast %cst_29 : f32 to vector<16x33xf32>
    %55 = arith.mulf %54, %51 : vector<16x33xf32>
    %56 = arith.mulf %55, %51 : vector<16x33xf32>
    %57 = arith.mulf %56, %51 : vector<16x33xf32>
    %58 = arith.addf %51, %57 : vector<16x33xf32>
    %cst_30 = arith.constant 0.797884583 : f32
    %59 = vector.broadcast %cst_30 : f32 to vector<16x33xf32>
    %60 = arith.mulf %59, %58 : vector<16x33xf32>
    %61 = math.tanh %60 : vector<16x33xf32>
    %cst_31 = arith.constant 1.000000e+00 : f32
    %62 = vector.broadcast %cst_31 : f32 to vector<16x33xf32>
    %63 = arith.addf %62, %61 : vector<16x33xf32>
    %64 = arith.mulf %53, %63 : vector<16x33xf32>
    %cst_32 = arith.constant dense<0.000000e+00> : vector<16x32xf32>
    %65 = tpu.matmul %64, %8, %cst_32 {dimension_numbers = #tpu.dot_dimension_numbers<[1], [0], [0], [1], [0, 0, 1, 1], [], []>} : vector<16x33xf32>, vector<33x32xf32>, vector<16x32xf32> -> vector<16x32xf32>
    %66 = vector.broadcast %9 : vector<1x32xf32> to vector<16x32xf32>
    %67 = arith.addf %65, %66 : vector<16x32xf32>
    %68 = vector.extract_strided_slice %67 {offsets = [0, 0], sizes = [16, 16], strides = [1, 1]} : vector<16x32xf32> to vector<16x16xf32>
    %69 = vector.extract_strided_slice %67 {offsets = [0, 16], sizes = [16, 16], strides = [1, 1]} : vector<16x32xf32> to vector<16x16xf32>
    %70 = arith.maximumf %68, %69 : vector<16x16xf32>
    %c0_33 = arith.constant 0 : index
    %c0_34 = arith.constant 0 : index
    %c0_35 = arith.constant 0 : index
    %71 = vector.load %arg2[%c0_33, %c0_34, %c0_35] : memref<1x64x17xf32, #tpu.memory_space<vmem>>, vector<1x64x17xf32>
    %72 = vector.shape_cast %71 : vector<1x64x17xf32> to vector<64x17xf32>
    %c0_36 = arith.constant 0 : index
    %c0_37 = arith.constant 0 : index
    %73 = vector.load %arg11[%c0_36, %c0_37] : memref<8x64xf32, #tpu.memory_space<vmem>>, vector<8x64xf32>
    %c0_38 = arith.constant 0 : index
    %c0_39 = arith.constant 0 : index
    %74 = vector.load %arg12[%c0_38, %c0_39] : memref<8x1xf32, #tpu.memory_space<vmem>>, vector<8x1xf32>
    %c0_40 = arith.constant 0 : index
    %c0_41 = arith.constant 0 : index
    %75 = vector.load %arg13[%c0_40, %c0_41] : memref<17x27xf32, #tpu.memory_space<vmem>>, vector<17x27xf32>
    %c0_42 = arith.constant 0 : index
    %c0_43 = arith.constant 0 : index
    %76 = vector.load %arg14[%c0_42, %c0_43] : memref<1x27xf32, #tpu.memory_space<vmem>>, vector<1x27xf32>
    %c0_44 = arith.constant 0 : index
    %c0_45 = arith.constant 0 : index
    %77 = vector.load %arg15[%c0_44, %c0_45] : memref<16x24xf32, #tpu.memory_space<vmem>>, vector<16x24xf32>
    %c0_46 = arith.constant 0 : index
    %c0_47 = arith.constant 0 : index
    %78 = vector.load %arg16[%c0_46, %c0_47] : memref<16x1xf32, #tpu.memory_space<vmem>>, vector<16x1xf32>
    %c0_48 = arith.constant 0 : index
    %c0_49 = arith.constant 0 : index
    %79 = vector.load %arg17[%c0_48, %c0_49] : memref<9x8xf32, #tpu.memory_space<vmem>>, vector<9x8xf32>
    %c0_50 = arith.constant 0 : index
    %c0_51 = arith.constant 0 : index
    %80 = vector.load %arg18[%c0_50, %c0_51] : memref<1x8xf32, #tpu.memory_space<vmem>>, vector<1x8xf32>
    %cst_52 = arith.constant dense<0.000000e+00> : vector<8x17xf32>
    %81 = tpu.matmul %73, %72, %cst_52 {dimension_numbers = #tpu.dot_dimension_numbers<[1], [0], [0], [1], [0, 0, 1, 1], [], []>} : vector<8x64xf32>, vector<64x17xf32>, vector<8x17xf32> -> vector<8x17xf32>
    %82 = vector.broadcast %74 : vector<8x1xf32> to vector<8x17xf32>
    %83 = arith.addf %81, %82 : vector<8x17xf32>
    %cst_53 = arith.constant 5.000000e-01 : f32
    %84 = vector.broadcast %cst_53 : f32 to vector<8x17xf32>
    %85 = arith.mulf %84, %83 : vector<8x17xf32>
    %cst_54 = arith.constant 4.471500e-02 : f32
    %86 = vector.broadcast %cst_54 : f32 to vector<8x17xf32>
    %87 = arith.mulf %86, %83 : vector<8x17xf32>
    %88 = arith.mulf %87, %83 : vector<8x17xf32>
    %89 = arith.mulf %88, %83 : vector<8x17xf32>
    %90 = arith.addf %83, %89 : vector<8x17xf32>
    %cst_55 = arith.constant 0.797884583 : f32
    %91 = vector.broadcast %cst_55 : f32 to vector<8x17xf32>
    %92 = arith.mulf %91, %90 : vector<8x17xf32>
    %93 = math.tanh %92 : vector<8x17xf32>
    %cst_56 = arith.constant 1.000000e+00 : f32
    %94 = vector.broadcast %cst_56 : f32 to vector<8x17xf32>
    %95 = arith.addf %94, %93 : vector<8x17xf32>
    %96 = arith.mulf %85, %95 : vector<8x17xf32>
    %cst_57 = arith.constant dense<0.000000e+00> : vector<8x27xf32>
    %97 = tpu.matmul %96, %75, %cst_57 {dimension_numbers = #tpu.dot_dimension_numbers<[1], [0], [0], [1], [0, 0, 1, 1], [], []>} : vector<8x17xf32>, vector<17x27xf32>, vector<8x27xf32> -> vector<8x27xf32>
    %98 = vector.broadcast %76 : vector<1x27xf32> to vector<8x27xf32>
    %99 = arith.addf %97, %98 : vector<8x27xf32>
    %100 = vector.extract_strided_slice %99 {offsets = [0, 0], sizes = [8, 9], strides = [1, 1]} : vector<8x27xf32> to vector<8x9xf32>
    %101 = vector.extract_strided_slice %99 {offsets = [0, 9], sizes = [8, 9], strides = [1, 1]} : vector<8x27xf32> to vector<8x9xf32>
    %102 = arith.maximumf %100, %101 : vector<8x9xf32>
    %103 = vector.extract_strided_slice %99 {offsets = [0, 18], sizes = [8, 9], strides = [1, 1]} : vector<8x27xf32> to vector<8x9xf32>
    %104 = arith.maximumf %102, %103 : vector<8x9xf32>
    %cst_58 = arith.constant 0.000000e+00 : f32
    %105 = vector.broadcast %cst_58 : f32 to vector<8x1xf32>
    %106 = vector.extract_strided_slice %104 {offsets = [0, 0], sizes = [8, 8], strides = [1, 1]} : vector<8x9xf32> to vector<8x8xf32>
    %107 = tpu.concatenate %105, %106 in 1 : vector<8x1xf32>, vector<8x8xf32> -> vector<8x9xf32>
    %cst_59 = arith.constant 0.000000e+00 : f32
    %108 = vector.broadcast %cst_59 : f32 to vector<8x1xf32>
    %109 = vector.extract_strided_slice %104 {offsets = [0, 1], sizes = [8, 8], strides = [1, 1]} : vector<8x9xf32> to vector<8x8xf32>
    %110 = tpu.concatenate %109, %108 in 1 : vector<8x8xf32>, vector<8x1xf32> -> vector<8x9xf32>
    %111 = tpu.concatenate %107, %104, %110 in 0 : vector<8x9xf32>, vector<8x9xf32>, vector<8x9xf32> -> vector<24x9xf32>
    %cst_60 = arith.constant dense<0.000000e+00> : vector<16x9xf32>
    %112 = tpu.matmul %77, %111, %cst_60 {dimension_numbers = #tpu.dot_dimension_numbers<[1], [0], [0], [1], [0, 0, 1, 1], [], []>} : vector<16x24xf32>, vector<24x9xf32>, vector<16x9xf32> -> vector<16x9xf32>
    %113 = vector.broadcast %78 : vector<16x1xf32> to vector<16x9xf32>
    %114 = arith.addf %112, %113 : vector<16x9xf32>
    %cst_61 = arith.constant 5.000000e-01 : f32
    %115 = vector.broadcast %cst_61 : f32 to vector<16x9xf32>
    %116 = arith.mulf %115, %114 : vector<16x9xf32>
    %cst_62 = arith.constant 4.471500e-02 : f32
    %117 = vector.broadcast %cst_62 : f32 to vector<16x9xf32>
    %118 = arith.mulf %117, %114 : vector<16x9xf32>
    %119 = arith.mulf %118, %114 : vector<16x9xf32>
    %120 = arith.mulf %119, %114 : vector<16x9xf32>
    %121 = arith.addf %114, %120 : vector<16x9xf32>
    %cst_63 = arith.constant 0.797884583 : f32
    %122 = vector.broadcast %cst_63 : f32 to vector<16x9xf32>
    %123 = arith.mulf %122, %121 : vector<16x9xf32>
    %124 = math.tanh %123 : vector<16x9xf32>
    %cst_64 = arith.constant 1.000000e+00 : f32
    %125 = vector.broadcast %cst_64 : f32 to vector<16x9xf32>
    %126 = arith.addf %125, %124 : vector<16x9xf32>
    %127 = arith.mulf %116, %126 : vector<16x9xf32>
    %cst_65 = arith.constant dense<0.000000e+00> : vector<16x8xf32>
    %128 = tpu.matmul %127, %79, %cst_65 {dimension_numbers = #tpu.dot_dimension_numbers<[1], [0], [0], [1], [0, 0, 1, 1], [], []>} : vector<16x9xf32>, vector<9x8xf32>, vector<16x8xf32> -> vector<16x8xf32>
    %129 = vector.broadcast %80 : vector<1x8xf32> to vector<16x8xf32>
    %130 = arith.addf %128, %129 : vector<16x8xf32>
    %131 = vector.extract_strided_slice %130 {offsets = [0, 0], sizes = [16, 4], strides = [1, 1]} : vector<16x8xf32> to vector<16x4xf32>
    %132 = vector.extract_strided_slice %130 {offsets = [0, 4], sizes = [16, 4], strides = [1, 1]} : vector<16x8xf32> to vector<16x4xf32>
    %133 = arith.maximumf %131, %132 : vector<16x4xf32>
    %134 = tpu.concatenate %70, %133 in 1 : vector<16x16xf32>, vector<16x4xf32> -> vector<16x20xf32>
    %c0_66 = arith.constant 0 : index
    %c0_67 = arith.constant 0 : index
    %135 = vector.load %arg19[%c0_66, %c0_67] : memref<8x16xf32, #tpu.memory_space<vmem>>, vector<8x16xf32>
    %cst_68 = arith.constant dense<0.000000e+00> : vector<8x20xf32>
    %136 = tpu.matmul %135, %134, %cst_68 {dimension_numbers = #tpu.dot_dimension_numbers<[1], [0], [0], [1], [0, 0, 1, 1], [], []>} : vector<8x16xf32>, vector<16x20xf32>, vector<8x20xf32> -> vector<8x20xf32>
    %c0_69 = arith.constant 0 : index
    %c0_70 = arith.constant 0 : index
    %137 = vector.load %arg20[%c0_69, %c0_70] : memref<8x1xf32, #tpu.memory_space<vmem>>, vector<8x1xf32>
    %138 = vector.broadcast %137 : vector<8x1xf32> to vector<8x20xf32>
    %139 = arith.addf %136, %138 : vector<8x20xf32>
    %cst_71 = arith.constant 0.000000e+00 : f32
    %140 = vector.broadcast %cst_71 : f32 to vector<8x20xf32>
    %141 = arith.maximumf %139, %140 : vector<8x20xf32>
    %c0_72 = arith.constant 0 : index
    %c0_73 = arith.constant 0 : index
    %142 = vector.load %arg21[%c0_72, %c0_73] : memref<8x8xf32, #tpu.memory_space<vmem>>, vector<8x8xf32>
    %cst_74 = arith.constant dense<0.000000e+00> : vector<8x20xf32>
    %143 = tpu.matmul %142, %141, %cst_74 {dimension_numbers = #tpu.dot_dimension_numbers<[1], [0], [0], [1], [0, 0, 1, 1], [], []>} : vector<8x8xf32>, vector<8x20xf32>, vector<8x20xf32> -> vector<8x20xf32>
    %c0_75 = arith.constant 0 : index
    %c0_76 = arith.constant 0 : index
    %144 = vector.load %arg22[%c0_75, %c0_76] : memref<8x1xf32, #tpu.memory_space<vmem>>, vector<8x1xf32>
    %145 = vector.broadcast %144 : vector<8x1xf32> to vector<8x20xf32>
    %146 = arith.addf %143, %145 : vector<8x20xf32>
    %cst_77 = arith.constant dense<0.000000e+00> : vector<8xf32>
    %147 = vector.multi_reduction <add>, %146, %cst_77 [1] : vector<8x20xf32> to vector<8xf32>
    %148 = vector.shape_cast %147 : vector<8xf32> to vector<8x1xf32>
    %cst_78 = arith.constant 5.000000e-02 : f32
    %149 = vector.broadcast %cst_78 : f32 to vector<8x1xf32>
    %150 = arith.mulf %148, %149 : vector<8x1xf32>
    %c0_79 = arith.constant 0 : index
    %c0_80 = arith.constant 0 : index
    %151 = vector.load %arg23[%c0_79, %c0_80] : memref<2x8xf32, #tpu.memory_space<vmem>>, vector<2x8xf32>
    %cst_81 = arith.constant dense<0.000000e+00> : vector<2x1xf32>
    %152 = tpu.matmul %151, %150, %cst_81 {dimension_numbers = #tpu.dot_dimension_numbers<[1], [0], [0], [1], [0, 0, 1, 1], [], []>} : vector<2x8xf32>, vector<8x1xf32>, vector<2x1xf32> -> vector<2x1xf32>
    %cst_82 = arith.constant 0.000000e+00 : f32
    %153 = vector.broadcast %cst_82 : f32 to vector<2x1xf32>
    %154 = arith.maximumf %152, %153 : vector<2x1xf32>
    %c0_83 = arith.constant 0 : index
    %c0_84 = arith.constant 0 : index
    %155 = vector.load %arg24[%c0_83, %c0_84] : memref<8x2xf32, #tpu.memory_space<vmem>>, vector<8x2xf32>
    %cst_85 = arith.constant dense<0.000000e+00> : vector<8x1xf32>
    %156 = tpu.matmul %155, %154, %cst_85 {dimension_numbers = #tpu.dot_dimension_numbers<[1], [0], [0], [1], [0, 0, 1, 1], [], []>} : vector<8x2xf32>, vector<2x1xf32>, vector<8x1xf32> -> vector<8x1xf32>
    %157 = arith.negf %156 : vector<8x1xf32>
    %158 = math.exp %157 : vector<8x1xf32>
    %cst_86 = arith.constant 1.000000e+00 : f32
    %159 = vector.broadcast %cst_86 : f32 to vector<8x1xf32>
    %160 = arith.addf %159, %158 : vector<8x1xf32>
    %161 = arith.divf %159, %160 : vector<8x1xf32>
    %c0_87 = arith.constant 0 : index
    %c0_88 = arith.constant 0 : index
    %162 = vector.load %arg25[%c0_87, %c0_88] : memref<8x16xf32, #tpu.memory_space<vmem>>, vector<8x16xf32>
    %cst_89 = arith.constant dense<0.000000e+00> : vector<8x20xf32>
    %163 = tpu.matmul %162, %134, %cst_89 {dimension_numbers = #tpu.dot_dimension_numbers<[1], [0], [0], [1], [0, 0, 1, 1], [], []>} : vector<8x16xf32>, vector<16x20xf32>, vector<8x20xf32> -> vector<8x20xf32>
    %c0_90 = arith.constant 0 : index
    %c0_91 = arith.constant 0 : index
    %164 = vector.load %arg26[%c0_90, %c0_91] : memref<8x1xf32, #tpu.memory_space<vmem>>, vector<8x1xf32>
    %165 = vector.broadcast %164 : vector<8x1xf32> to vector<8x20xf32>
    %166 = arith.addf %163, %165 : vector<8x20xf32>
    %167 = vector.broadcast %161 : vector<8x1xf32> to vector<8x20xf32>
    %168 = arith.mulf %146, %167 : vector<8x20xf32>
    %169 = arith.addf %168, %166 : vector<8x20xf32>
    %cst_92 = arith.constant 0.000000e+00 : f32
    %170 = vector.broadcast %cst_92 : f32 to vector<8x20xf32>
    %171 = arith.maximumf %169, %170 : vector<8x20xf32>
    %c0_93 = arith.constant 0 : index
    %c0_94 = arith.constant 0 : index
    %c0_95 = arith.constant 0 : index
    %172 = vector.load %arg27[%c0_93, %c0_94, %c0_95] : memref<5x8x20xf32, #tpu.memory_space<vmem>>, vector<1x8x20xf32>
    %173 = vector.shape_cast %172 : vector<1x8x20xf32> to vector<8x20xf32>
    %174 = arith.mulf %171, %173 : vector<8x20xf32>
    %cst_96 = arith.constant dense<0.000000e+00> : vector<8xf32>
    %175 = vector.multi_reduction <add>, %174, %cst_96 [1] : vector<8x20xf32> to vector<8xf32>
    %176 = vector.shape_cast %175 : vector<8xf32> to vector<8x1xf32>
    %c1 = arith.constant 1 : index
    %c0_97 = arith.constant 0 : index
    %c0_98 = arith.constant 0 : index
    %177 = vector.load %arg27[%c1, %c0_97, %c0_98] : memref<5x8x20xf32, #tpu.memory_space<vmem>>, vector<1x8x20xf32>
    %178 = vector.shape_cast %177 : vector<1x8x20xf32> to vector<8x20xf32>
    %179 = arith.mulf %171, %178 : vector<8x20xf32>
    %cst_99 = arith.constant dense<0.000000e+00> : vector<8xf32>
    %180 = vector.multi_reduction <add>, %179, %cst_99 [1] : vector<8x20xf32> to vector<8xf32>
    %181 = vector.shape_cast %180 : vector<8xf32> to vector<8x1xf32>
    %c2 = arith.constant 2 : index
    %c0_100 = arith.constant 0 : index
    %c0_101 = arith.constant 0 : index
    %182 = vector.load %arg27[%c2, %c0_100, %c0_101] : memref<5x8x20xf32, #tpu.memory_space<vmem>>, vector<1x8x20xf32>
    %183 = vector.shape_cast %182 : vector<1x8x20xf32> to vector<8x20xf32>
    %184 = arith.mulf %171, %183 : vector<8x20xf32>
    %cst_102 = arith.constant dense<0.000000e+00> : vector<8xf32>
    %185 = vector.multi_reduction <add>, %184, %cst_102 [1] : vector<8x20xf32> to vector<8xf32>
    %186 = vector.shape_cast %185 : vector<8xf32> to vector<8x1xf32>
    %c3 = arith.constant 3 : index
    %c0_103 = arith.constant 0 : index
    %c0_104 = arith.constant 0 : index
    %187 = vector.load %arg27[%c3, %c0_103, %c0_104] : memref<5x8x20xf32, #tpu.memory_space<vmem>>, vector<1x8x20xf32>
    %188 = vector.shape_cast %187 : vector<1x8x20xf32> to vector<8x20xf32>
    %189 = arith.mulf %171, %188 : vector<8x20xf32>
    %cst_105 = arith.constant dense<0.000000e+00> : vector<8xf32>
    %190 = vector.multi_reduction <add>, %189, %cst_105 [1] : vector<8x20xf32> to vector<8xf32>
    %191 = vector.shape_cast %190 : vector<8xf32> to vector<8x1xf32>
    %c4 = arith.constant 4 : index
    %c0_106 = arith.constant 0 : index
    %c0_107 = arith.constant 0 : index
    %192 = vector.load %arg27[%c4, %c0_106, %c0_107] : memref<5x8x20xf32, #tpu.memory_space<vmem>>, vector<1x8x20xf32>
    %193 = vector.shape_cast %192 : vector<1x8x20xf32> to vector<8x20xf32>
    %194 = arith.mulf %171, %193 : vector<8x20xf32>
    %cst_108 = arith.constant dense<0.000000e+00> : vector<8xf32>
    %195 = vector.multi_reduction <add>, %194, %cst_108 [1] : vector<8x20xf32> to vector<8xf32>
    %196 = vector.shape_cast %195 : vector<8xf32> to vector<8x1xf32>
    %197 = tpu.concatenate %176, %181, %186, %191, %196 in 1 : vector<8x1xf32>, vector<8x1xf32>, vector<8x1xf32>, vector<8x1xf32>, vector<8x1xf32> -> vector<8x5xf32>
    %cst_109 = arith.constant dense<0.000000e+00> : vector<5xf32>
    %198 = vector.multi_reduction <add>, %197, %cst_109 [0] : vector<8x5xf32> to vector<5xf32>
    %199 = vector.shape_cast %198 : vector<5xf32> to vector<1x5xf32>
    %c0_110 = arith.constant 0 : index
    %c0_111 = arith.constant 0 : index
    %200 = vector.load %arg28[%c0_110, %c0_111] : memref<1x5xf32, #tpu.memory_space<vmem>>, vector<1x5xf32>
    %201 = arith.addf %199, %200 : vector<1x5xf32>
    %c0_112 = arith.constant 0 : index
    %c0_113 = arith.constant 0 : index
    %c0_114 = arith.constant 0 : index
    %202 = vector.load %arg29[%c0_112, %c0_113, %c0_114] : memref<1x1x5xf32, #tpu.memory_space<vmem>>, vector<1x1x5xf32>
    %203 = vector.shape_cast %202 : vector<1x1x5xf32> to vector<1x5xf32>
    %204 = vector.shape_cast %201 : vector<1x5xf32> to vector<1x1x5xf32>
    tpu.vector_store %arg29[%c0_112, %c0_113, %c0_114], %204 {strides = array<i32>} : memref<1x1x5xf32, #tpu.memory_space<vmem>>, vector<1x1x5xf32>,
    return
  }
  func.func @transform_0(%arg0: i32) -> (i32, i32, i32) {
    %c0_i32 = arith.constant 0 : i32
    %c0_i32_0 = arith.constant 0 : i32
    %c0_i32_1 = arith.constant 0 : i32
    return %arg0, %c0_i32, %c0_i32_0 : i32, i32, i32
  }
  func.func @transform_1(%arg0: i32) -> (i32, i32, i32) {
    %c0_i32 = arith.constant 0 : i32
    %c0_i32_0 = arith.constant 0 : i32
    %c0_i32_1 = arith.constant 0 : i32
    return %arg0, %c0_i32, %c0_i32_0 : i32, i32, i32
  }
  func.func @transform_2(%arg0: i32) -> (i32, i32) {
    %c0_i32 = arith.constant 0 : i32
    %c0_i32_0 = arith.constant 0 : i32
    %c0_i32_1 = arith.constant 0 : i32
    return %c0_i32, %c0_i32_0 : i32, i32
  }
  func.func @transform_3(%arg0: i32) -> (i32, i32) {
    %c0_i32 = arith.constant 0 : i32
    %c0_i32_0 = arith.constant 0 : i32
    %c0_i32_1 = arith.constant 0 : i32
    return %c0_i32, %c0_i32_0 : i32, i32
  }
  func.func @transform_4(%arg0: i32) -> (i32, i32) {
    %c0_i32 = arith.constant 0 : i32
    %c0_i32_0 = arith.constant 0 : i32
    %c0_i32_1 = arith.constant 0 : i32
    return %c0_i32, %c0_i32_0 : i32, i32
  }
  func.func @transform_5(%arg0: i32) -> (i32, i32) {
    %c0_i32 = arith.constant 0 : i32
    %c0_i32_0 = arith.constant 0 : i32
    %c0_i32_1 = arith.constant 0 : i32
    return %c0_i32, %c0_i32_0 : i32, i32
  }
  func.func @transform_6(%arg0: i32) -> (i32, i32) {
    %c0_i32 = arith.constant 0 : i32
    %c0_i32_0 = arith.constant 0 : i32
    %c0_i32_1 = arith.constant 0 : i32
    return %c0_i32, %c0_i32_0 : i32, i32
  }
  func.func @transform_7(%arg0: i32) -> (i32, i32) {
    %c0_i32 = arith.constant 0 : i32
    %c0_i32_0 = arith.constant 0 : i32
    %c0_i32_1 = arith.constant 0 : i32
    return %c0_i32, %c0_i32_0 : i32, i32
  }
  func.func @transform_8(%arg0: i32) -> (i32, i32) {
    %c0_i32 = arith.constant 0 : i32
    %c0_i32_0 = arith.constant 0 : i32
    %c0_i32_1 = arith.constant 0 : i32
    return %c0_i32, %c0_i32_0 : i32, i32
  }
  func.func @transform_9(%arg0: i32) -> (i32, i32) {
    %c0_i32 = arith.constant 0 : i32
    %c0_i32_0 = arith.constant 0 : i32
    %c0_i32_1 = arith.constant 0 : i32
    return %c0_i32, %c0_i32_0 : i32, i32
  }
  func.func @transform_10(%arg0: i32) -> (i32, i32) {
    %c0_i32 = arith.constant 0 : i32
    %c0_i32_0 = arith.constant 0 : i32
    %c0_i32_1 = arith.constant 0 : i32
    return %c0_i32, %c0_i32_0 : i32, i32
  }
  func.func @transform_11(%arg0: i32) -> (i32, i32) {
    %c0_i32 = arith.constant 0 : i32
    %c0_i32_0 = arith.constant 0 : i32
    %c0_i32_1 = arith.constant 0 : i32
    return %c0_i32, %c0_i32_0 : i32, i32
  }
  func.func @transform_12(%arg0: i32) -> (i32, i32) {
    %c0_i32 = arith.constant 0 : i32
    %c0_i32_0 = arith.constant 0 : i32
    %c0_i32_1 = arith.constant 0 : i32
    return %c0_i32, %c0_i32_0 : i32, i32
  }
  func.func @transform_13(%arg0: i32) -> (i32, i32) {
    %c0_i32 = arith.constant 0 : i32
    %c0_i32_0 = arith.constant 0 : i32
    %c0_i32_1 = arith.constant 0 : i32
    return %c0_i32, %c0_i32_0 : i32, i32
  }
  func.func @transform_14(%arg0: i32) -> (i32, i32) {
    %c0_i32 = arith.constant 0 : i32
    %c0_i32_0 = arith.constant 0 : i32
    %c0_i32_1 = arith.constant 0 : i32
    return %c0_i32, %c0_i32_0 : i32, i32
  }
  func.func @transform_15(%arg0: i32) -> (i32, i32) {
    %c0_i32 = arith.constant 0 : i32
    %c0_i32_0 = arith.constant 0 : i32
    %c0_i32_1 = arith.constant 0 : i32
    return %c0_i32, %c0_i32_0 : i32, i32
  }
  func.func @transform_16(%arg0: i32) -> (i32, i32) {
    %c0_i32 = arith.constant 0 : i32
    %c0_i32_0 = arith.constant 0 : i32
    %c0_i32_1 = arith.constant 0 : i32
    return %c0_i32, %c0_i32_0 : i32, i32
  }
  func.func @transform_17(%arg0: i32) -> (i32, i32) {
    %c0_i32 = arith.constant 0 : i32
    %c0_i32_0 = arith.constant 0 : i32
    %c0_i32_1 = arith.constant 0 : i32
    return %c0_i32, %c0_i32_0 : i32, i32
  }
  func.func @transform_18(%arg0: i32) -> (i32, i32) {
    %c0_i32 = arith.constant 0 : i32
    %c0_i32_0 = arith.constant 0 : i32
    %c0_i32_1 = arith.constant 0 : i32
    return %c0_i32, %c0_i32_0 : i32, i32
  }
  func.func @transform_19(%arg0: i32) -> (i32, i32) {
    %c0_i32 = arith.constant 0 : i32
    %c0_i32_0 = arith.constant 0 : i32
    %c0_i32_1 = arith.constant 0 : i32
    return %c0_i32, %c0_i32_0 : i32, i32
  }
  func.func @transform_20(%arg0: i32) -> (i32, i32) {
    %c0_i32 = arith.constant 0 : i32
    %c0_i32_0 = arith.constant 0 : i32
    %c0_i32_1 = arith.constant 0 : i32
    return %c0_i32, %c0_i32_0 : i32, i32
  }
  func.func @transform_21(%arg0: i32) -> (i32, i32) {
    %c0_i32 = arith.constant 0 : i32
    %c0_i32_0 = arith.constant 0 : i32
    %c0_i32_1 = arith.constant 0 : i32
    return %c0_i32, %c0_i32_0 : i32, i32
  }
  func.func @transform_22(%arg0: i32) -> (i32, i32) {
    %c0_i32 = arith.constant 0 : i32
    %c0_i32_0 = arith.constant 0 : i32
    %c0_i32_1 = arith.constant 0 : i32
    return %c0_i32, %c0_i32_0 : i32, i32
  }
  func.func @transform_23(%arg0: i32) -> (i32, i32) {
    %c0_i32 = arith.constant 0 : i32
    %c0_i32_0 = arith.constant 0 : i32
    %c0_i32_1 = arith.constant 0 : i32
    return %c0_i32, %c0_i32_0 : i32, i32
  }
  func.func @transform_24(%arg0: i32) -> (i32, i32) {
    %c0_i32 = arith.constant 0 : i32
    %c0_i32_0 = arith.constant 0 : i32
    %c0_i32_1 = arith.constant 0 : i32
    return %c0_i32, %c0_i32_0 : i32, i32
  }
  func.func @transform_25(%arg0: i32) -> (i32, i32) {
    %c0_i32 = arith.constant 0 : i32
    %c0_i32_0 = arith.constant 0 : i32
    %c0_i32_1 = arith.constant 0 : i32
    return %c0_i32, %c0_i32_0 : i32, i32
  }
  func.func @transform_26(%arg0: i32) -> (i32, i32, i32) {
    %c0_i32 = arith.constant 0 : i32
    %c0_i32_0 = arith.constant 0 : i32
    %c0_i32_1 = arith.constant 0 : i32
    %c0_i32_2 = arith.constant 0 : i32
    return %c0_i32, %c0_i32_0, %c0_i32_1 : i32, i32, i32
  }
  func.func @transform_27(%arg0: i32) -> (i32, i32) {
    %c0_i32 = arith.constant 0 : i32
    %c0_i32_0 = arith.constant 0 : i32
    %c0_i32_1 = arith.constant 0 : i32
    return %c0_i32, %c0_i32_0 : i32, i32
  }
  func.func @transform_28(%arg0: i32) -> (i32, i32, i32) {
    %c0_i32 = arith.constant 0 : i32
    %c0_i32_0 = arith.constant 0 : i32
    %c0_i32_1 = arith.constant 0 : i32
    return %arg0, %c0_i32, %c0_i32_0 : i32, i32, i32
  }
}

</mosaic_0001>

<bundles_post_ra>
// kernel: model_blue_forward.1
= control target key start
LH: loop header
LB: loop body
LE: loop exit
PB: predicated region body
PF: predicated region fallthrough
CT: control target
= control target key end

     0   :  { %s2326_s0 = inlined_call_operand.vmem [shape: f32[2,16,65], index: 0, kind: input, shape index: {}]   ;;  %s2327_s1 = inlined_call_operand.vmem [shape: f32[2,64,17], index: 1, kind: input, shape index: {}]   ;;  %s2328_s2 = inlined_call_operand.vmem [shape: f32[8,16], index: 2, kind: input, shape index: {}]   ;;  %s2329_s3 = inlined_call_operand.vmem [shape: f32[8,1], index: 3, kind: input, shape index: {}]   ;;  %s2330_s4 = inlined_call_operand.vmem [shape: f32[65,132], index: 4, kind: input, shape index: {}]   ;;  %s2331_s5 = inlined_call_operand.vmem [shape: f32[1,132], index: 5, kind: input, shape index: {}]   ;;  %s2332_s6 = inlined_call_operand.vmem [shape: f32[16,40], index: 6, kind: input, shape index: {}]   ;;  %s2333_s7 = inlined_call_operand.vmem [shape: f32[16,1], index: 7, kind: input, shape index: {}]   ;;  %s2334_s8 = inlined_call_operand.vmem [shape: f32[33,32], index: 8, kind: input, shape index: {}]   ;;  %s2335_s9 = inlined_call_operand.vmem [shape: f32[1,32], index: 9, kind: input, shape index: {}]   ;;  %s2336_s10 = inlined_call_operand.vmem [shape: f32[8,64], index: 10, kind: input, shape index: {}]   ;;  %s2337_s11 = inlined_call_operand.vmem [shape: f32[8,1], index: 11, kind: input, shape index: {}]   ;;  %s2338_s12 = inlined_call_operand.vmem [shape: f32[17,27], index: 12, kind: input, shape index: {}]   ;;  %s2339_s13 = inlined_call_operand.vmem [shape: f32[1,27], index: 13, kind: input, shape index: {}]   ;;  %s2340_s14 = inlined_call_operand.vmem [shape: f32[16,24], index: 14, kind: input, shape index: {}]   ;;  %s2341_s15 = inlined_call_operand.vmem [shape: f32[16,1], index: 15, kind: input, shape index: {}]   ;;  %s2342_s16 = inlined_call_operand.vmem [shape: f32[9,8], index: 16, kind: input, shape index: {}]   ;;  %s2343_s17 = inlined_call_operand.vmem [shape: f32[1,8], index: 17, kind: input, shape index: {}]   ;;  %s2344_s18 = inlined_call_operand.vmem [shape: f32[8,16], index: 18, kind: input, shape index: {}]   ;;  %s2345_s19 = inlined_call_operand.vmem [shape: f32[8,1], index: 19, kind: input, shape index: {}]   ;;  %s2346_s20 = inlined_call_operand.vmem [shape: f32[8,8], index: 20, kind: input, shape index: {}]   ;;  %s2347_s21 = inlined_call_operand.vmem [shape: f32[8,1], index: 21, kind: input, shape index: {}]   ;;  %s2348_s22 = inlined_call_operand.vmem [shape: f32[2,8], index: 22, kind: input, shape index: {}]   ;;  %s2349_s23 = inlined_call_operand.vmem [shape: f32[8,2], index: 23, kind: input, shape index: {}]   ;;  %s2350_s24 = inlined_call_operand.vmem [shape: f32[8,16], index: 24, kind: input, shape index: {}]   ;;  %s2351_s25 = inlined_call_operand.vmem [shape: f32[8,1], index: 25, kind: input, shape index: {}]   ;;  %s2352_s26 = inlined_call_operand.vmem [shape: f32[5,8,20], index: 26, kind: input, shape index: {}]   ;;  %s2353_s27 = inlined_call_operand.vmem [shape: f32[1,5], index: 27, kind: input, shape index: {}]   ;;  %s2354_s28 = inlined_call_operand.hbm [shape: f32[2,1,5], index: 28, kind: output, shape index: {}]  }
   0x1   :  { %2375 = sst [smem:[#allocation12_spill]] %s2326_s0 }
   0x2   :  { %2376 = sst [smem:[#allocation13_spill]] %s2327_s1 }
   0x3   :  { %2377 = sst [smem:[#allocation14_spill]] %s2328_s2 }
   0x4   :  { %2378 = sst [smem:[#allocation15_spill]] %s2329_s3 }
   0x5   :  { %2379 = sst [smem:[#allocation16_spill]] %s2330_s4 }
   0x6   :  { %2380 = sst [smem:[#allocation17_spill]] %s2331_s5 }
   0x7   :  { %2381 = sst [smem:[#allocation18_spill]] %s2332_s6 }
   0x8   :  { %2382 = sst [smem:[#allocation19_spill]] %s2333_s7 }
   0x9   :  { %2383 = sst [smem:[#allocation20_spill]] %s2334_s8 }
   0xa   :  { %2384 = sst [smem:[#allocation21_spill]] %s2335_s9 }
   0xb   :  { %2385 = sst [smem:[#allocation22_spill]] %s2336_s10 }
   0xc   :  { %2386 = sst [smem:[#allocation23_spill]] %s2337_s11 }
   0xd   :  { %2387 = sst [smem:[#allocation24_spill]] %s2338_s12 }
   0xe   :  { %2388 = sst [smem:[#allocation25_spill]] %s2339_s13 }
   0xf   :  { %2389 = sst [smem:[#allocation26_spill]] %s2353_s27 }
  0x10   :  { %2390 = sst [smem:[#allocation27_spill]] %s2354_s28 }
  0x11   :  { %33 = vsyncpa [#allocation3], 0 }
  0x12   :  { %35 = vsyncpa [#allocation3 + $0x1], 0  ;;  %s2019_s8 = smov 0   ;;  %s2021_s5 = smov 0  }
  0x13   :  { %s2023_s9 = smov 0   ;;  %s2025_s30 = smov 0  }
  0x14 LB: > { %2391 = sst [smem:[#allocation5_spill]] %s1847_s8  ;;  %s2040_s3 = sadd.s32 4294967295, %s1859_s30   ;;  %s1859_s30 = sphi %s2025_s30, %s2426_s30   ;;  %s1855_s9 = sphi %s2023_s9, %s2428_s9   ;;  %s1851_s5 = sphi %s2021_s5, %s2430_s5   ;;  %s1847_s8 = sphi %s2019_s8, %s2429_s8  }
  0x15   : > { %2392 = sst [smem:[#allocation6_spill]] %s1855_s9  ;;  %s1658_s6 = sadd.s32 4294967294, %s1859_s30  }
  0x16   : > { %2393 = sst [smem:[#allocation7_spill]] %s1859_s30  ;;  %s2044_s10 = sadd.s32 1, %s1859_s30  }
  0x17   : > { %2394 = sst [smem:[#allocation8_spill]] %s2044_s10  ;;  %s646_s0 = sadd.s32 1, %s1855_s9 }
  0x18   : > { %s643_s11 = ssub.s32 %s1859_s30, %s2044_s10  ;;  %p656_p0 = scmp.ne.s32.totalorder %s1855_s9, %s1851_s5 }
  0x19   : > { %p644_p1 = scmp.eq.s32.totalorder %s643_s11, 0  ;;  %p657_p2 = scmp.eq.s32.totalorder %s2040_s3, 1 }
  0x1a   : > { %p662_p3 = scmp.ne.s32.totalorder %s1851_s5, %s1847_s8  ;;  %p663_p4 = scmp.eq.s32.totalorder %s1658_s6, 1 }
  0x1b   : > { %s2055_s29 = scalar_select %p644_p1, %s1855_s9, %s646_s0  }
  0x1c   : > { %p2057_p5 = por %p657_p2, %p656_p0  ;;  %p2061_p6 = por %p663_p4, %p662_p3 }
  0x1d   : > { %2395 = sst [smem:[#allocation9_spill]] %s2055_s29  ;;  %p1661_p7 = scmp.ge.s32.totalorder %s1859_s30, 1 }
  0x1e   : > { %s2396_s2 = scalar_select %p2057_p5, 1, 0 }
  0x1f   : > { %s2398_s7 = scalar_select %p2061_p6, 1, 0 }
  0x20   : > { %2397 = sst [smem:[#allocation10_spill]] %s2396_s2  ;;  %p775_p8 = scmp.lt.s32.totalorder %s1859_s30, 3 }
  0x21   : > { %2399 = sst [smem:[#allocation11_spill]] %s2398_s7 }
  0x22   : > { %p776_p9 = pnand %p1661_p7, %p775_p8 }
  0x23   : > { %p853_p10 = scmp.lt.s32.totalorder (!%p776_p9), %s2040_s3, 1  ;;  %s2400_s4 = sld [smem:[#allocation15_spill]] (!%p776_p9) }
  0x24   : > { %779 = sbr.rel (%p776_p9) target bundleno = 2572 (0xa0c), region = 132  ;;  %s2401_s9 = sld [smem:[#allocation12_spill]] (!%p776_p9) }
  0x25   : > { %s2402_s12 = sld [smem:[#allocation14_spill]] (!%p776_p9)  ;;  %s1862_s28 = smov (!%p776_p9), 62  }
  0x26   : > { %s2403_s30 = sld [smem:[#allocation16_spill]] (!%p776_p9)  ;;  %s1864_s1 = smov (!%p776_p9), 29  }
  0x27   : > { %s2405_s27 = sld [smem:[#allocation17_spill]] (!%p776_p9)  ;;  %s1872_s29 = smov (!%p776_p9), 124  }
  0x28   : > { %s2406_s7 = sld [smem:[#allocation23_spill]] (!%p776_p9) }
  0x29   : > { %v866_v0 = vld [vmem:[%s2400_s4] sm:$0xff]  ;;  %v1861_v1 = vmov 0   ;;  %s2072_s6 = scalar_select %p853_p10, %s2040_s3, 1  ;;  %vm901_vm0 = vcmask 130048   ;;  %vm943_vm1 = vcmask 1040384   ;;  %vm939_vm2 = vcmask 531456  }
  0x2a   : > { %1760 = vset.pattern.permute.xlu0 %v1861_v1  ;;  %1761 = vset.pattern.permute.xlu2 %v1861_v1  ;;  %vm1004_vm3 = vcmask 236544   ;;  %s2370_s4 = smov 1   ;;  %vm1027_vm4 = vcmask 252928   ;;  %vm1022_vm5 = vcmask 261120   ;;  %vm1017_vm6 = vcmask 7168   ;;  %s2413_s13 = sld [smem:[#allocation25_spill]] }
  0x2b   : > { %898 = vperm.xlu0 %1760, %v866_v0   ;;  %1762 = vset.pattern.permute.xlu1 %v1861_v1  ;;  %s1706_s0 = sshll.u32 %s2072_s6, 4  ;;  %v865_v4 = vld [vmem:[%s2402_s12] sm:$0xff]  ;;  %s1863_s12 = smov 95   ;;  %vm1012_vm7 = vcmask 15360   ;;  %vm2148_vm8 = vmneg %vm1017_vm6  ;;  %vm1039_vm10 = vcmask 326656   ;;  %vm1159_vm11 = vcmask 523264  }
  0x2c   : > { %s857_s10 = scalar_lea.vmem %s2401_s9, %s1706_s0  ;;  %s2404_s2 = smov %s2403_s30  ;;  %v883_v5 = vld [vmem:[%s2403_s30 + $0x80] sm:$0x1]  ;;  %vm1675_vm9 = vmneg %vm1012_vm7  ;;  %vm1195_vm12 = vcmask 138240   ;;  %vm1090_vm13 = vcmask 269312   ;;  %vm1239_vm14 = vcmask 64512   ;;  %vm1251_vm15 = vcmask 195584  }
  0x2d   : > { %v864_v2 = vld [vmem:[%s857_s10 + $0x8] sm:$0xff]  ;;  %v863_v3 = vld [vmem:[%s857_s10] sm:$0xff]  ;;  %v881_v7 = vld [vmem:[%s2404_s2 + $0x70] sm:$0xff]  ;;  %1667 = vmatpush.msk.msra.mxu1 %vm943_vm1, %v883_v5  ;;  %s2369_s9 = smov 127   ;;  %s1867_s10 = smov 126  }
  0x2e   : > { %919 = vmatpush.msra.mxu0 %v864_v2  ;;  %v884_v6 = vld [vmem:[%s2404_s2 + $0x88] sm:$0x1]  ;;  %v882_v8 = vld [vmem:[%s2404_s2 + $0x78] sm:$0xff]  ;;  %v879_v9 = vld [vmem:[%s2404_s2 + $0x60] sm:$0xff]  ;;  %s1868_s0 = smov 2   ;;  %s1707_s30 = sshll.u32 %s2072_s6, 6 }
  0x2f   : > { %1669 = vmatpush.msk.msra.mxu2 %vm943_vm1, %v884_v6  ;;  %v880_v10 = vld [vmem:[%s2404_s2 + $0x68] sm:$0xff]  ;;  %958 = vmatpush.msra.mxu1 %v881_v7  ;;  %v877_v11 = vld [vmem:[%s2404_s2 + $0x50] sm:$0xff]  ;;  %v878_v12 = vld [vmem:[%s2404_s2 + $0x58] sm:$0xff]  ;;  %s2414_s6 = sld [smem:[#allocation19_spill]] }
  0x30   : > { %920 = vmatpush.msra.mxu0 %v863_v3  ;;  %v875_v13 = vld [vmem:[%s2404_s2 + $0x40] sm:$0xff]  ;;  %v876_v14 = vld [vmem:[%s2404_s2 + $0x48] sm:$0xff]  ;;  %v873_v15 = vld [vmem:[%s2404_s2 + $0x30] sm:$0xff]  ;;  %s2418_s11 = sld [smem:[#allocation21_spill]] }
  0x31   : > { %1666 = vmatmul.msk.f32.vlgmr.msra.gmra.mxu0 %vm901_vm0, %v865_v4  ;;  %978 = vmatpush.msra.mxu2 %v882_v8  ;;  %v874_v16 = vld [vmem:[%s2404_s2 + $0x38] sm:$0xff]  ;;  %v871_v17 = vld [vmem:[%s2404_s2 + $0x20] sm:$0xff]  ;;  %v872_v18 = vld [vmem:[%s2404_s2 + $0x28] sm:$0xff]  ;;  %s2419_s8 = sld [smem:[#allocation27_spill]] }
  0x32   : > { %959 = vmatpush.msra.mxu1 %v879_v9  ;;  %v869_v19 = vld [vmem:[%s2404_s2 + $0x10] sm:$0xff]  ;;  %v870_v20 = vld [vmem:[%s2404_s2 + $0x18] sm:$0xff]  ;;  %v867_v21 = vld [vmem:[%s2404_s2] sm:$0xff] }
  0x33   : > { %979 = vmatpush.msra.mxu2 %v880_v10  ;;  %v868_v22 = vld [vmem:[%s2404_s2 + $0x8] sm:$0xff]  ;;  %v885_v35 = vld [vmem:[%s2405_s27] sm:$0x3]  ;;  %s1871_s27 = smov 112  }
  0x34   : > { %960 = vmatpush.msra.mxu1 %v877_v11  ;;  %v935_v36 = vperm.slane %v885_v35, 0  ;;  %v936_v39 = vperm.slane %v885_v35, 1  ;;  %v1142_v50 = vld [vmem:[%s2406_s7] sm:$0xff] }
  0x35   : > { %980 = vmatpush.msra.mxu2 %v878_v12 }
  0x36   : > { %961 = vmatpush.msra.mxu1 %v875_v13 }
  0x37   : > { %981 = vmatpush.msra.mxu2 %v876_v14  ;;  %s1587_s7 = scalar_lea.hbm %s2419_s8, %s2040_s3 }
  0x38   : > { %962 = vmatpush.msra.mxu1 %v873_v15 }
  0x39   : > { %982 = vmatpush.msra.mxu2 %v874_v16 }
  0x3a   : > { %963 = vmatpush.msra.mxu1 %v871_v17 }
  0x3b   : > { %983 = vmatpush.msra.mxu2 %v872_v18 }
  0x3c   : > { %964 = vmatpush.msra.mxu1 %v869_v19 }
  0x3d   : > { %984 = vmatpush.msra.mxu2 %v870_v20  ;;  %v1778_v20 = vld [vmem:[%s2413_s13] ss:$0 sm:$0xff] }
  0x3e   : > { %965 = vmatpush.msra.mxu1 %v867_v21 }
  0x3f   : > { %985 = vmatpush.msra.mxu2 %v868_v22 }
  0x9d   : > { %v899_v23 = vpop.permute.xlu0 %898 }
  0xae   : > { %v922_v24 = vpop.f32.mrf.mxu0 }
  0xaf   : > { %v923_v25 = vadd.f32 %v922_v24, %v899_v23  ;;  %v888_v23 = vld [vmem:[%s2414_s6] sm:$0xff] }
  0xb1   : > { %v926_v26 = vmul.f32 0.044715, %v923_v25  ;;  %v925_v32 = vmul.f32 0.5, %v923_v25 }
  0xb3   : > { %v927_v27 = vmul.f32 %v926_v26, %v923_v25 }
  0xb5   : > { %v928_v28 = vmul.f32 %v927_v27, %v923_v25 }
  0xb7   : > { %v929_v29 = vadd.f32 %v928_v28, %v923_v25 }
  0xb9   : > { %v930_v30 = vmul.f32 0.7978846, %v929_v29 }
  0xbb   : > { %1781 = vtanh.f32 %v930_v30 }
  0xc1   : > { %v1782_v31 = vpop.eup %1781 }
  0xc2   : > { %v932_v33 = vadd.f32 1.0, %v1782_v31 }
  0xc4   : > { %v933_v34 = vmul.f32 %v932_v33, %v925_v32 }
  0xc6   : > { %1668 = vmatmul.msk.f32.vlgmr.msra.gmra.mxu1 %vm939_vm2, %v933_v34  ;;  %1670 = vmatmul.msk.f32.vlgmr.msra.gmra.mxu2 %vm939_vm2, %v933_v34  ;;  %vm1416_vm2 = vcmask 162816  }
 0x143   : > { %v967_v37 = vpop.f32.mrf.mxu1 }
 0x144   : > { %v968_v38 = vadd.f32 %v967_v37, %v935_v36 }
 0x146   : > { %995 = vrot.lane.b32.xlu1 %v968_v38, %s1862_s28  ;;  %991 = vrot.lane.b32.xlu0 %v968_v38, %s1863_s12  ;;  %s2409_s28 = sld [smem:[#allocation13_spill]] }
 0x149   : > { %v987_v40 = vpop.f32.mrf.mxu2 }
 0x14a   : > { %v988_v41 = vadd.f32 %v987_v40, %v936_v39 }
 0x14c   : > { %1002 = vrot.lane.b32.xlu2 %v988_v41, %s1864_s1  ;;  %s862_s12 = scalar_lea.vmem %s2409_s28, %s1707_s30  ;;  %s2411_s30 = sld [smem:[#allocation22_spill]] }
 0x14d   : > { %v1140_v57 = vld [vmem:[%s862_s12 + $0x38] sm:$0xff]  ;;  %v1139_v58 = vld [vmem:[%s862_s12 + $0x30] sm:$0xff]  ;;  %v1138_v59 = vld [vmem:[%s862_s12 + $0x28] sm:$0xff]  ;;  %s2412_s28 = sld [smem:[#allocation24_spill]] }
 0x14e   : > { %1000 = vrot.lane.b32.xlu1 %v968_v38, %s1864_s1  ;;  %v1137_v60 = vld [vmem:[%s862_s12 + $0x20] sm:$0xff]  ;;  %v1136_v62 = vld [vmem:[%s862_s12 + $0x18] sm:$0xff]  ;;  %v1135_v63 = vld [vmem:[%s862_s12 + $0x10] sm:$0xff] }
 0x14f   : > { %v1134_v0 = vld [vmem:[%s862_s12 + $0x8] sm:$0xff]  ;;  %v1133_v1 = vld [vmem:[%s862_s12] sm:$0xff]  ;;  %s2415_s12 = sld [smem:[#allocation20_spill]] }
 0x152   : > { %v1141_v2 = vld [vmem:[%s2411_s30] sm:$0xff]  ;;  %s1870_s30 = smov 119  }
 0x153   : > { %v1145_v3 = vld [vmem:[%s2412_s28 + $0x10] sm:$0x1]  ;;  %v1144_v4 = vld [vmem:[%s2412_s28 + $0x8] sm:$0xff]  ;;  %v1143_v5 = vld [vmem:[%s2412_s28] sm:$0xff] }
 0x154   : > { %1683 = vmatpush.msk.msrb.mxu1 %vm943_vm1, %v1145_v3 }
 0x155   : > { %v894_v24 = vld [vmem:[%s2415_s12 + $0x20] sm:$0x1]  ;;  %v893_v25 = vld [vmem:[%s2415_s12 + $0x18] sm:$0xff]  ;;  %v892_v26 = vld [vmem:[%s2415_s12 + $0x10] sm:$0xff] }
 0x156   : > { %1216 = vmatpush.msrb.mxu1 %v1144_v4  ;;  %1679 = vmatpush.msk.msrb.mxu0 %vm943_vm1, %v894_v24  ;;  %v891_v27 = vld [vmem:[%s2415_s12 + $0x8] sm:$0xff]  ;;  %v890_v28 = vld [vmem:[%s2415_s12] sm:$0xff] }
 0x158   : > { %1217 = vmatpush.msrb.mxu1 %v1143_v5  ;;  %1112 = vmatpush.msrb.mxu0 %v893_v25 }
 0x15a   : > { %1113 = vmatpush.msrb.mxu0 %v892_v26 }
 0x15c   : > { %1114 = vmatpush.msrb.mxu0 %v891_v27 }
 0x15e   : > { %1115 = vmatpush.msrb.mxu0 %v890_v28 }
 0x1a6   : > { %v1003_v45 = vpop.permute.xlu2 %1002 }
 0x1b8   : > { %v996_v42 = vpop.permute.xlu1 %995  ;;  %v992_v43 = vpop.permute.xlu0 %991 }
 0x1b9   : > { %v994_v44 = vmax.f32 %v968_v38, %v992_v43 }
 0x1bb   : > { %v998_v46 = vmax.f32 %v994_v44, %v996_v42  ;;  %v889_v44 = vld [vmem:[%s2414_s6 + $0x8] sm:$0xff] }
 0x1c0   : > { %v1001_v47 = vpop.permute.xlu1 %1000 }
 0x1c1   : > { %v1005_v48 = vsel %vm1004_vm3, %v1001_v47, %v1003_v45  ;;  %v1149_v45 = vld [vmem:[%s2341_s15] sm:$0xff]  ;;  %vm1450_vm3 = vcmask 1041408  }
 0x1c2   : > { %v1007_v49 = vmax.f32 %v998_v46, %v1005_v48  ;;  %v1150_v46 = vld [vmem:[%s2341_s15 + $0x8] sm:$0xff]  ;;  %v1147_v48 = vld [vmem:[%s2340_s14] sm:$0xff] }
 0x1c4   : > { %1014 = vrot.lane.b32.xlu1 %v1007_v49, %s2370_s4  ;;  %1019 = vrot.lane.b32.xlu0 %v1007_v49, %s2369_s9  ;;  %s2416_s4 = smov 1   ;;  %s2417_s9 = smov 127  }
 0x1c5   : > { %1024 = vrot.lane.b32.xlu2 %v1007_v49, %s1867_s10  ;;  %s2410_s10 = sld [smem:[#allocation18_spill]] }
 0x1cb   : > { %v886_v55 = vld [vmem:[%s2410_s10] sm:$0xff]  ;;  %v887_v61 = vld [vmem:[%s2410_s10 + $0x8] sm:$0xff]  ;;  %s1591_s10 = sshll.u32 %s1587_s7, 4  ;;  %s1592_s10 = int_to_ptr.hbm [resolvable:$true] %s1591_s10 }
 0x1cc   : > { %1156 = vperm.xlu0 %1760, %v1142_v50   ;;  %s1811_s13 = sshra.s32 %s1592_s10, 4  ;;  %s1812_s13 = int_to_ptr.hbm [resolvable:$true] %s1811_s13 }
 0x1cd   : > { %1009 = vrot.lane.b32.xlu2 %v1007_v49, %s1868_s0  ;;  %s1869_s0 = smov 110  }
 0x21f   : > { %v1025_v51 = vpop.permute.xlu2 %1024 }
 0x220   : > { %1671 = vmatpush.msk.msra.mxu3 %vm1027_vm4, %v1025_v51 }
 0x227   : > { %v1010_v56 = vpop.permute.xlu2 %1009 }
 0x236   : > { %v1020_v52 = vpop.permute.xlu0 %1019  ;;  %v1015_v54 = vpop.permute.xlu1 %1014 }
 0x237   : > { %1672 = vmatpush.msk.msra.mxu3 %vm1022_vm5, %v1020_v52 }
 0x239   : > { %1059 = vmatpush.msra.mxu3 %v1007_v49 }
 0x23b   : > { %1674 = vmatpush.msk.msra.mxu3 %vm2148_vm8, %v1015_v54  ;;  %v1148_v54 = vld [vmem:[%s2340_s14 + $0x8] sm:$0xff] }
 0x23d   : > { %1676 = vmatpush.msk.msra.mxu3 %vm1675_vm9, %v1010_v56  ;;  %vm1562_vm9 = vcmask 23552  }
 0x23e   : > { %1677 = vmatmul.msk.f32.vlgmr.msra.gmra.mxu3 %vm1039_vm10, %v886_v55  ;;  %v1157_v8 = vpop.permute.xlu0 %1156 }
 0x23f   : > { %1171 = vmatpush.msrb.mxu3 %v1140_v57 }
 0x241   : > { %1172 = vmatpush.msrb.mxu3 %v1139_v58 }
 0x243   : > { %1173 = vmatpush.msrb.mxu3 %v1138_v59 }
 0x245   : > { %1174 = vmatpush.msrb.mxu3 %v1137_v60 }
 0x246   : > { %1678 = vmatmul.msk.f32.gmra.mxu3 %vm1039_vm10, %v887_v61  ;;  %vm1564_vm10 = vcmask 31744  }
 0x247   : > { %1175 = vmatpush.msrb.mxu3 %v1136_v62  ;;  %v1152_v62 = vld [vmem:[%s2342_s16 + $0x8] sm:$0x1] }
 0x248   : > { %1690 = vmatpush.msk.msra.mxu0 %vm943_vm1, %v1152_v62  ;;  %vm1302_vm1 = vcmask 72704  }
 0x249   : > { %1176 = vmatpush.msrb.mxu3 %v1135_v63  ;;  %v1151_v63 = vld [vmem:[%s2342_s16] sm:$0xff] }
 0x24a   : > { %1327 = vmatpush.msra.mxu0 %v1151_v63 }
 0x24b   : > { %1177 = vmatpush.msrb.mxu3 %v1134_v0 }
 0x24d   : > { %1178 = vmatpush.msrb.mxu3 %v1133_v1 }
 0x24e   : > { %1682 = vmatmul.msk.f32.vlgmr.msrb.gmra.mxu3 %vm1159_vm11, %v1141_v2  ;;  %vm1566_vm11 = vcmask 39936  }
 0x2c1   : > { %v1063_v6 = vpop.f32.mrf.mxu3 }
 0x2c9   : > { %v2177_v7 = vpop.f32.mrf.mxu3 }
 0x2d1   : > { %v1180_v9 = vpop.f32.mrf.mxu3 }
 0x2d2   : > { %v1181_v10 = vadd.f32 %v1180_v9, %v1157_v8 }
 0x2d4   : > { %v1184_v11 = vmul.f32 0.044715, %v1181_v10  ;;  %v1183_v17 = vmul.f32 0.5, %v1181_v10 }
 0x2d6   : > { %v1185_v12 = vmul.f32 %v1184_v11, %v1181_v10 }
 0x2d8   : > { %v1186_v13 = vmul.f32 %v1185_v12, %v1181_v10 }
 0x2da   : > { %v1187_v14 = vadd.f32 %v1186_v13, %v1181_v10 }
 0x2dc   : > { %v1188_v15 = vmul.f32 0.7978846, %v1187_v14 }
 0x2de   : > { %1783 = vtanh.f32 %v1188_v15  ;;  %v1779_v15 = vld [vmem:[%s2418_s11] ss:$0 sm:$0xff]  ;;  %s2421_s11 = sld [smem:[#allocation26_spill]] }
 0x2e4   : > { %v1784_v16 = vpop.eup %1783 }
 0x2e5   : > { %v1190_v18 = vadd.f32 1.0, %v1784_v16 }
 0x2e7   : > { %v1191_v19 = vmul.f32 %v1190_v18, %v1183_v17 }
 0x2e9   : > { %1684 = vmatmul.msk.f32.vlgmr.msrb.gmra.mxu1 %vm1195_vm12, %v1191_v19 }
 0x366   : > { %v1219_v21 = vpop.f32.mrf.mxu1 }
 0x367   : > { %v1220_v22 = vadd.f32 %v1778_v20, %v1219_v21 }
 0x369   : > { %1227 = vrot.lane.b32.xlu2 %v1220_v22, %s1869_s0  ;;  %1223 = vrot.lane.b32.xlu1 %v1220_v22, %s1870_s30 }
 0x371   : > { %1031 = vperm.xlu2 %1761, %v888_v23  }
 0x379   : > { %1248 = vperm.xlu2 %1761, %v1150_v46  }
 0x3c3   : > { %v1228_v29 = vpop.permute.xlu2 %1227 }
 0x3cb   : > { %v1032_v30 = vpop.permute.xlu2 %1031 }
 0x3cc   : > { %v1064_v31 = vadd.f32 %v1063_v6, %v1032_v30  ;;  %v1387_v30 = vld [vmem:[%s2347_s21] sm:$0xff] }
 0x3ce   : > { %v1071_v32 = vmul.f32 0.044715, %v1064_v31  ;;  %v1069_v41 = vmul.f32 0.5, %v1064_v31 }
 0x3d0   : > { %v1073_v33 = vmul.f32 %v1071_v32, %v1064_v31  ;;  %v1780_v32 = vld [vmem:[%s2343_s17] ss:$0 sm:$0xff] }
 0x3d2   : > { %v1075_v34 = vmul.f32 %v1073_v33, %v1064_v31 }
 0x3d3   : > { %v1249_v6 = vpop.permute.xlu2 %1248 }
 0x3d4   : > { %v1077_v35 = vadd.f32 %v1075_v34, %v1064_v31 }
 0x3d6   : > { %v1079_v36 = vmul.f32 0.7978846, %v1077_v35 }
 0x3d8   : > { %1785 = vtanh.f32 %v1079_v36 }
 0x3db   : > { %v1224_v37 = vpop.permute.xlu1 %1223 }
 0x3dc   : > { %v1226_v38 = vmax.f32 %v1220_v22, %v1224_v37  ;;  %v1356_v37 = vld [vmem:[%s2345_s19] sm:$0xff] }
 0x3de   : > { %v1786_v39 = vpop.eup %1785  ;;  %v1230_v40 = vmax.f32 %v1226_v38, %v1228_v29  ;;  %v1494_v38 = vld [vmem:[%s2351_s25] sm:$0xff] }
 0x3df   : > { %v1083_v42 = vadd.f32 1.0, %v1786_v39 }
 0x3e0   : > { %1232 = vrot.lane.b32.xlu1 %v1230_v40, %s2416_s4  ;;  %1236 = vrot.lane.b32.xlu0 %v1230_v40, %s2417_s9  ;;  %s851_s4 = sand.u32 1, %s1851_s5   ;;  %s1813_s9 = scalar_lea.hbm %s1812_s13, 1 }
 0x3e1   : > { %v1085_v43 = vmul.f32 %v1083_v42, %v1069_v41  ;;  %s852_s2 = scalar_lea.vmem [#allocation2], %s851_s4  ;;  %s1579_s12 = scalar_lea.sflag [#allocation3], %s851_s4 }
 0x3e2   : > { %s1589_s6 = sshll.u32 %s852_s2, 4  ;;  %p1814_p11 = scmp.ne.s32.totalorder %s1812_s13, %s1813_s9  ;;  %s1590_s6 = int_to_ptr.vmem [resolvable:$true] %s1589_s6 }
 0x3e3   : > { %1680 = vmatmul.msk.f32.vlgmr.msrb.gmra.mxu0 %vm1090_vm13, %v1085_v43 }
 0x3e4   : > { %p1815_p12 = pnand %p1814_p11, %p2057_p5 }
 0x3e6   : > { %p1816_p13 = pneg %p1815_p12 }
 0x3e8   : > { %1036 = vperm.xlu0 %1760, %v889_v44   ;;  %1243 = vperm.xlu1 %1762, %v1149_v45  }
 0x452   : > { %v1237_v47 = vpop.permute.xlu0 %1236  ;;  %v1233_v49 = vpop.permute.xlu1 %1232 }
 0x453   : > { %1685 = vmatpush.msk.msrb.mxu2 %vm1239_vm14, %v1237_v47 }
 0x455   : > { %1272 = vmatpush.msrb.mxu2 %v1230_v40 }
 0x457   : > { %1687 = vmatpush.msk.msrb.mxu2 %vm2148_vm8, %v1233_v49 }
 0x458   : > { %1688 = vmatmul.msk.f32.vlgmr.msrb.gmra.mxu2 %vm1251_vm15, %v1147_v48 }
 0x45a   : > { %v1037_v50 = vpop.permute.xlu0 %1036  ;;  %v1244_v0 = vpop.permute.xlu1 %1243 }
 0x45b   : > { %v1067_v51 = vadd.f32 %v2177_v7, %v1037_v50 }
 0x45d   : > { %v1072_v52 = vmul.f32 0.044715, %v1067_v51  ;;  %v1070_v60 = vmul.f32 0.5, %v1067_v51 }
 0x45f   : > { %v1074_v55 = vmul.f32 %v1072_v52, %v1067_v51 }
 0x460   : > { %1689 = vmatmul.msk.f32.gmra.mxu2 %vm1251_vm15, %v1148_v54  ;;  %v1117_v12 = vpop.f32.mrf.mxu0 }
 0x461   : > { %v1076_v56 = vmul.f32 %v1074_v55, %v1067_v51  ;;  %v1118_v22 = vadd.f32 %v1779_v15, %v1117_v12  ;;  %v1355_v55 = vld [vmem:[%s2344_s18] sm:$0xff] }
 0x463   : > { %v1078_v57 = vadd.f32 %v1076_v56, %v1067_v51 }
 0x465   : > { %v1080_v58 = vmul.f32 0.7978846, %v1078_v57 }
 0x467   : > { %1787 = vtanh.f32 %v1080_v58 }
 0x46d   : > { %v1788_v59 = vpop.eup %1787 }
 0x46e   : > { %v1084_v61 = vadd.f32 1.0, %v1788_v59 }
 0x470   : > { %v1086_v53 = vmul.f32 %v1084_v61, %v1070_v60  ;;  %v1386_v61 = vld [vmem:[%s2346_s20] sm:$0xff] }
 0x472   : > { %1681 = vmatmul.msk.f32.gmra.mxu0 %vm1090_vm13, %v1086_v53  ;;  %v1493_v53 = vld [vmem:[%s2350_s24] sm:$0xff] }
 0x4db   : > { %v1275_v1 = vpop.f32.mrf.mxu2 }
 0x4dc   : > { %v1276_v2 = vadd.f32 %v1275_v1, %v1244_v0 }
 0x4de   : > { %v1283_v3 = vmul.f32 0.044715, %v1276_v2  ;;  %v1281_v19 = vmul.f32 0.5, %v1276_v2 }
 0x4e0   : > { %v1285_v4 = vmul.f32 %v1283_v3, %v1276_v2 }
 0x4e2   : > { %v1287_v5 = vmul.f32 %v1285_v4, %v1276_v2  ;;  %v1421_v4 = vld [vmem:[%s2348_s22] sm:$0x3] }
 0x4e3   : > { %v1278_v7 = vpop.f32.mrf.mxu2 }
 0x4e4   : > { %v1289_v8 = vadd.f32 %v1287_v5, %v1276_v2  ;;  %v1279_v9 = vadd.f32 %v1278_v7, %v1249_v6  ;;  %v1446_v7 = vld [vmem:[%s2349_s23] sm:$0xff] }
 0x4e6   : > { %v1291_v10 = vmul.f32 0.7978846, %v1289_v8  ;;  %v1284_v11 = vmul.f32 0.044715, %v1279_v9  ;;  %v1282_v27 = vmul.f32 0.5, %v1279_v9 }
 0x4e8   : > { %1789 = vtanh.f32 %v1291_v10  ;;  %v1286_v13 = vmul.f32 %v1284_v11, %v1279_v9 }
 0x4ea   : > { %v1288_v14 = vmul.f32 %v1286_v13, %v1279_v9 }
 0x4ec   : > { %v1290_v16 = vadd.f32 %v1288_v14, %v1279_v9 }
 0x4ee   : > { %v1790_v17 = vpop.eup %1789  ;;  %v1292_v18 = vmul.f32 0.7978846, %v1290_v16 }
 0x4ef   : > { %v1120_v20 = vpop.f32.mrf.mxu0  ;;  %v1295_v21 = vadd.f32 1.0, %v1790_v17 }
 0x4f0   : > { %v1121_v23 = vadd.f32 %v1779_v15, %v1120_v20  ;;  %1791 = vtanh.f32 %v1292_v18 }
 0x4f1   : > { %v1297_v24 = vmul.f32 %v1295_v21, %v1281_v19 }
 0x4f2   : > { %v1768_v25 = vpack.i.bf16 %v1118_v22, %v1121_v23 }
 0x4f3   : > { %1691 = vmatmul.msk.f32.vlgmr.msra.gmra.mxu0 %vm1302_vm1, %v1297_v24 }
 0x4f4   : > { %1769 = vrot.lane.b32.xlu1 %v1768_v25, %s1871_s27  ;;  %s1873_s27 = smov 16  }
 0x4f6   : > { %v1792_v26 = vpop.eup %1791 }
 0x4f7   : > { %v1296_v28 = vadd.f32 1.0, %v1792_v26 }
 0x4f9   : > { %v1298_v29 = vmul.f32 %v1296_v28, %v1282_v27  ;;  %v1701_v28 = vld [vmem:[%s2352_s26 + $0x10] sm:$0xff] }
 0x4fb   : > { %1692 = vmatmul.msk.f32.gmra.mxu0 %vm1302_vm1, %v1298_v29  ;;  %v1700_v29 = vld [vmem:[%s2352_s26 + $0x8] sm:$0xff] }
 0x4fc   : > { %1390 = vperm.xlu1 %1762, %v1387_v30   ;;  %v1531_v30 = vld [vmem:[%s2352_s26] sm:$0xff] }
 0x566   : > { %v1770_v45 = vpop.permute.xlu1 %1769 }
 0x567   : > { %v1771_v46 = vunpack.i.l.bf16 %v1770_v45  ;;  %v1772_v47 = vunpack.i.h.bf16 %v1770_v45 }
 0x569   : > { %v1132_v49 = vmax.f32 %v1121_v23, %v1771_v46  ;;  %v1131_v52 = vmax.f32 %v1118_v22, %v1772_v47 }
 0x56e   : > { %v1391_v62 = vpop.permute.xlu1 %1390 }
 0x570   : > { %v1329_v31 = vpop.f32.mrf.mxu0 }
 0x571   : > { %v1330_v34 = vadd.f32 %v1780_v32, %v1329_v31 }
 0x578   : > { %v1332_v33 = vpop.f32.mrf.mxu0 }
 0x579   : > { %v1333_v35 = vadd.f32 %v1780_v32, %v1332_v33 }
 0x57b   : > { %v1763_v36 = vpack.i.bf16 %v1330_v34, %v1333_v35 }
 0x57d   : > { %1764 = vrot.lane.b32.xlu0 %v1763_v36, %s1872_s29  ;;  %s2420_s29 = smov %s2419_s8 }
 0x57e   : > { %s1817_s8 = scalar_lea.hbm %s2420_s29, 2  ;;  %p1818_p0 = scmp.lt.s32.totalorder %s1812_s13, %s2420_s29 }
 0x57f   : > { %p1819_p1 = scmp.lt.s32.totalorder %s1817_s8, %s1813_s9 }
 0x581   : > { %p1820_p2 = por %p1819_p1, %p1818_p0 }
 0x583   : > { %p1821_p3 = pnand %p1820_p2, %p1816_p13 }
 0x585   : > { %1359 = vperm.xlu0 %1760, %v1356_v37  }
 0x58d   : > { %1497 = vperm.xlu0 %1760, %v1494_v38   ;;  %v1702_v38 = vld [vmem:[%s2352_s26 + $0x18] sm:$0xff] }
 0x5ef   : > { %v1765_v39 = vpop.permute.xlu0 %1764 }
 0x5f0   : > { %v1767_v40 = vunpack.i.h.bf16 %v1765_v39  ;;  %v1766_v41 = vunpack.i.l.bf16 %v1765_v39 }
 0x5f2   : > { %v1343_v42 = vmax.f32 %v1330_v34, %v1767_v40  ;;  %v1344_v43 = vmax.f32 %v1333_v35, %v1766_v41  ;;  %v1703_v41 = vld [vmem:[%s2352_s26 + $0x20] sm:$0xff] }
 0x5f4   : > { %v1773_v44 = vpack.i.bf16 %v1343_v42, %v1344_v43 }
 0x5f6   : > { %1774 = vrot.lane.b32.xlu2 %v1773_v44, %s1873_s27 }
 0x5f7   : > { %v1360_v57 = vpop.permute.xlu0 %1359 }
 0x5ff   : > { %v1498_v23 = vpop.permute.xlu0 %1497 }
 0x650   : > { %v1775_v48 = vpop.permute.xlu2 %1774 }
 0x651   : > { %v1777_v50 = vunpack.i.h.bf16 %v1775_v48  ;;  %v1776_v51 = vunpack.i.l.bf16 %v1775_v48 }
 0x653   : > { %v1354_v54 = vsel %vm901_vm0, %v1132_v49, %v1776_v51  ;;  %v1353_v56 = vsel %vm901_vm0, %v1131_v52, %v1777_v50 }
 0x654   : > { %1379 = vmatpush.msra.mxu1 %v1354_v54 }
 0x656   : > { %1380 = vmatpush.msra.mxu1 %v1353_v56 }
 0x657   : > { %1693 = vmatmul.msk.f32.vlgmr.msra.gmra.mxu1 %vm901_vm0, %v1355_v55 }
 0x6d4   : > { %v1382_v58 = vpop.f32.mrf.mxu1 }
 0x6d5   : > { %v1383_v59 = vadd.f32 %v1382_v58, %v1360_v57 }
 0x6d7   : > { %v1385_v60 = vmax.f32 %v1383_v59, 0.0 }
 0x6d9   : > { %1411 = vmatpush.msra.mxu3 %v1385_v60  ;;  %v1574_v60 = vld [vmem:[%s2421_s11] sm:$0x1] }
 0x6da   : > { %1694 = vmatmul.msk.f32.vlgmr.msra.gmra.mxu3 %vm1239_vm14, %v1386_v61 }
 0x6db   : > { %1517 = vmatpush.msrb.mxu3 %v1354_v54 }
 0x6dd   : > { %1518 = vmatpush.msrb.mxu3 %v1353_v56 }
 0x6e2   : > { %1699 = vmatmul.msk.f32.vlgmr.msrb.gmra.mxu3 %vm901_vm0, %v1493_v53 }
 0x75d   : > { %v1413_v63 = vpop.f32.mrf.mxu3 }
 0x75e   : > { %v1414_v0 = vadd.f32 %v1413_v63, %v1391_v62 }
 0x760   : > { %v1417_v1 = vsel %vm1416_vm2, %v1414_v0, 0.0 }
 0x761   : > { %1418 = vadd.xlane.f32.xlu2 %v1417_v1 }
 0x765   : > { %v1520_v22 = vpop.f32.mrf.mxu3 }
 0x766   : > { %v1521_v25 = vadd.f32 %v1520_v22, %v1498_v23 }
 0x7d4   : > { %v1419_v2 = vpop.xlane.xlu2 %1418 }
 0x7d5   : > { %v1420_v3 = vmul.f32 0.05, %v1419_v2 }
 0x7d7   : > { %1440 = vmatpush.msrb.mxu1 %v1420_v3 }
 0x7d8   : > { %1695 = vmatmul.msk.f32.vlgmr.msrb.gmra.mxu1 %vm1239_vm14, %v1421_v4 }
 0x855   : > { %v1442_v5 = vpop.f32.mrf.mxu1 }
 0x856   : > { %v1445_v6 = vmax.f32 %v1442_v5, 0.0 }
 0x858   : > { %1696 = vmatpush.msk.msra.mxu2 %vm1450_vm3, %v1445_v6 }
 0x859   : > { %1697 = vmatmul.msk.f32.vlgmr.msra.gmra.mxu2 %vm1012_vm7, %v1446_v7 }
 0x8dc   : > { %v1471_v8 = vpop.f32.mrf.mxu2 }
 0x8dd   : > { %v1698_v9 = vmul.f32 -1.442695, %v1471_v8 }
 0x8df   : > { %1793 = vpow2.f32 %v1698_v9 }
 0x8e5   : > { %v1794_v10 = vpop.eup %1793 }
 0x8e6   : > { %v1477_v11 = vadd.f32 1.0, %v1794_v10 }
 0x8e8   : > { %1795 = vrcp.f32 %v1477_v11  ;;  %v1489_v15 = vand.u32 2147483648, %v1477_v11  ;;  %v1487_v17 = vand.u32 2147483647, %v1477_v11  ;;  %vm1483_vm4 = vweird.f32 %v1477_v11 }
 0x8ea   : > { %v1490_v19 = vor.u32 1.1754944e-38, %v1489_v15  ;;  %vm1488_vm8 = vcmp.eq.f32.partialorder %v1487_v17, 8.507059e+37 }
 0x8ee   : > { %v1796_v12 = vpop.eup %1795 }
 0x8ef   : > { %v1479_v13 = vmul.f32 %v1796_v12, %v1477_v11  ;;  %vm1484_vm0 = vweird.f32 %v1796_v12 }
 0x8f0   : > { %vm1485_vm5 = vmor %vm1483_vm4, %vm1484_vm0 }
 0x8f1   : > { %v1480_v14 = vsub.f32 1.0, %v1479_v13 }
 0x8f3   : > { %v1481_v16 = vmul.f32 %v1796_v12, %v1480_v14 }
 0x8f5   : > { %v1482_v18 = vadd.f32 %v1796_v12, %v1481_v16 }
 0x8f7   : > { %v1486_v20 = vsel %vm1485_vm5, %v1796_v12, %v1482_v18 }
 0x8f8   : > { %v1491_v21 = vsel %vm1488_vm8, %v1490_v19, %v1486_v20 }
 0x8f9   : > { %1525 = vperm.xlu1 %1762, %v1491_v21  }
 0x96b   : > { %v1526_v24 = vpop.permute.xlu1 %1525 }
 0x96c   : > { %v1528_v26 = vmul.f32 %v1526_v24, %v1414_v0 }
 0x96e   : > { %v1529_v27 = vadd.f32 %v1528_v26, %v1521_v25 }
 0x970   : > { %v1530_v31 = vmax.f32 %v1529_v27, 0.0 }
 0x972   : > { %v1544_v32 = vmul.f32 %v1701_v28, %v1530_v31  ;;  %v1538_v33 = vmul.f32 %v1700_v29, %v1530_v31  ;;  %v1532_v34 = vmul.f32 %v1531_v30, %v1530_v31  ;;  %v1550_v39 = vmul.f32 %v1702_v38, %v1530_v31 }
 0x973   : > { %v1556_v42 = vmul.f32 %v1703_v41, %v1530_v31 }
 0x974   : > { %v1545_v35 = vsel %vm1416_vm2, %v1544_v32, 0.0  ;;  %v1539_v36 = vsel %vm1416_vm2, %v1538_v33, 0.0  ;;  %v1533_v37 = vsel %vm1416_vm2, %v1532_v34, 0.0  ;;  %v1551_v40 = vsel %vm1416_vm2, %v1550_v39, 0.0 }
 0x975   : > { %1546 = vadd.xlane.f32.xlu2 %v1545_v35  ;;  %1540 = vadd.xlane.f32.xlu1 %v1539_v36  ;;  %v1557_v43 = vsel %vm1416_vm2, %v1556_v42, 0.0 }
 0x976   : > { %1534 = vadd.xlane.f32.xlu0 %v1533_v37 }
 0x97d   : > { %1552 = vadd.xlane.f32.xlu2 %v1551_v40 }
 0x985   : > { %1558 = vadd.xlane.f32.xlu2 %v1557_v43 }
 0x9e8   : > { %v1547_v44 = vpop.xlane.xlu2 %1546  ;;  %v1541_v46 = vpop.xlane.xlu1 %1540 }
 0x9e9   : > { %v1535_v47 = vpop.xlane.xlu0 %1534 }
 0x9ea   : > { %v1560_v48 = vsel %vm1017_vm6, %v1535_v47, %v1541_v46  ;;  %vm1576_vm6 = vcmask 32768  }
 0x9eb   : > { %v1561_v49 = vsel %vm1012_vm7, %v1560_v48, %v1547_v44 }
 0x9f0   : > { %v1553_v45 = vpop.xlane.xlu2 %1552 }
 0x9f1   : > { %v1563_v50 = vsel %vm1562_vm9, %v1561_v49, %v1553_v45 }
 0x9f8   : > { %v1559_v51 = vpop.xlane.xlu2 %1558 }
 0x9f9   : > { %v1565_v52 = vsel %vm1564_vm10, %v1563_v50, %v1559_v51 }
 0x9fa   : > { %v1567_v54 = vsel %vm1566_vm11, %v1565_v52, 0.0 }
 0x9fb   : > { %v1568_v55 = vrot.slane %v1567_v54, 4 }
 0x9fd   : > { %v1569_v56 = vadd.f32 %v1568_v55, %v1567_v54 }
 0x9ff   : > { %v1570_v57 = vrot.slane %v1569_v56, 2 }
 0xa01   : > { %v1571_v58 = vadd.f32 %v1570_v57, %v1569_v56 }
 0xa03   : > { %v1572_v59 = vrot.slane %v1571_v58, 1 }
 0xa05   : > { %v1573_v61 = vadd.f32 %v1572_v59, %v1571_v58 }
 0xa07   : > { %v1575_v53 = vadd.f32 %v1574_v60, %v1573_v61 }
 0xa09   : > { %1577 = vst.msk [vmem:[%s852_s2] sm:$0x1] %vm1576_vm6, %v1575_v53 }
 0xa0a   : > { %1824 = shalt.err (!%p1821_p3)
}
 0xa0b   : > { %1708 = dma.vmem_to_hbm [thread:$0]  (%p2057_p5), %s1590_s6, 16, %s1592_s10, %s1579_s12  }
 0xa0c PF: > { %s2423_s2 = sld [smem:[#allocation7_spill]] }
 0xa0d   : > { %s2424_s4 = sld [smem:[#allocation5_spill]] }
 0xa12   : > { %p1714_p4 = scmp.ge.s32.totalorder %s2423_s2, 2 }
 0xa13   : > { %s1603_s11 = sand.u32 1, %s2424_s4  }
 0xa14   : > { %p1711_p7 = pnand %p1714_p4, %p2061_p6  ;;  %s1604_s3 = scalar_lea.sflag [#allocation3], %s1603_s11 }
 0xa16   : > { %p1712_p8 = pneg %p1711_p7 }
 0xa18   : > { %1842 = dma.done.wait (%p1712_p8), %s1604_s3, 16  }
 0xa19   : > { %1844 = vsyncadd (%p1712_p8), %s1604_s3, 4294967280  ;;  %s2426_s30 = sld [smem:[#allocation8_spill]]  ;;  %s2429_s8 = smov %s1851_s5 }
 0xa1a   : > { %s2427_s13 = sld [smem:[#allocation6_spill]] }
 0xa1b   : > { %s2428_s9 = sld [smem:[#allocation9_spill]] }
 0xa1f   : > { %p38_p9 = scmp.ge.s32.totalorder %s2426_s30, 4  }
 0xa20   : > { %s2430_s5 = smov %s2427_s13 }
 0xa21   :  { %40 = sbr.rel (!%p38_p9) target bundleno = 20 (0x14), region = 174 }
 0xa26   :  { %1609 = vsyncpa [#allocation3], 1 }
 0xa27   :  { %1611 = vsyncpa [#allocation3 + $0x1], 1 }

</bundles_post_ra>
